<compile_context>
chip_gen: v7x
topology: tpu7x:2x2x1
jax: 0.10.0
libtpu: 0.0.40
codegen_flags: <defaults>
</compile_context>

<pallas_src>
import math

import jax
import jax.numpy as jnp
from jax.experimental import pallas as pl
from jax.experimental.pallas import tpu as pltpu


def _round_up(n: int, m: int) -> int:
    return ((n + m - 1) // m) * m


def _conv_pads(kernel_size: int, causal: bool):
    if causal:
        return kernel_size - 1, 0            # causal: all taps look backwards
    return (kernel_size - 1) // 2, kernel_size // 2   # "same" padding


# ---------------------------------------------------------------------------
# Pallas kernel: both conv layers + activation + masking for one time tile.
# ---------------------------------------------------------------------------
def make_ffn_kernel(kernel_size, causal, activation, tile_t, halo, t_round,
                    f_pad, co_pad, compute_dtype):
    pad_l, _ = _conv_pads(kernel_size, causal)
    offsets = tuple(j - pad_l for j in range(kernel_size))
    ext = tile_t + 2 * halo                 # extended rows (tile + both halos)

    def kernel(xl_ref, xc_ref, xr_ref, ml_ref, mc_ref, mr_ref,
               w1_ref, b1_ref, w2_ref, b2_ref, o_ref):
        t0 = pl.program_id(1) * tile_t

        # Halo-extended tile: local row r corresponds to global row t0 - halo + r.
        x_ext = jnp.concatenate([xl_ref[0], xc_ref[0], xr_ref[0]],
                                axis=0).astype(jnp.float32)          # [E, Ci_p]
        m_ext = jnp.concatenate([ml_ref[0], mc_ref[0], mr_ref[0]],
                                axis=0).astype(jnp.float32)          # [E, 1]

        # Rows whose global index falls outside [0, T_round) are the conv's zero
        # padding (their halo DMA was clamped, so fetched data/mask is garbage).
        g = t0 - halo + jax.lax.broadcasted_iota(jnp.int32, (ext, 1), 0)
        valid = jnp.logical_and(g >= 0, g < t_round).astype(jnp.float32)
        mk = m_ext * valid                                           # [E, 1]

        xm = x_ext * mk                                              # x * x_mask

        # conv_1: per-tap shifted GEMMs.  Rolls are XLU-slot sublane rotations;
        # wrap-around rows only pollute rows outside the needed h range.
        acc1 = jnp.zeros((ext, f_pad), jnp.float32)
        for off in offsets:
            tap = xm if off == 0 else pltpu.roll(xm, shift=(-off) % ext, axis=0)
            acc1 = acc1 + jnp.dot(tap.astype(compute_dtype),
                                  w1_ref[off + pad_l],
                                  preferred_element_type=jnp.float32)
        h = acc1 + b1_ref[...]

        if activation == "gelu":
            h = h * jax.nn.sigmoid(1.702 * h)                        # EUP
        else:
            h = jnp.maximum(h, 0.0)
        # TODO(synk): nn.Dropout is identity (p_dropout = 0 / eval mode).

        hm = h * mk                                                  # act(h) * mask

        # conv_2: each tap is a static sublane slice of the extended h buffer,
        # so the MXU only sees the tile_t output rows.
        acc2 = jnp.zeros((tile_t, co_pad), jnp.float32)
        for off in offsets:
            tap = hm[halo + off: halo + off + tile_t, :]
            acc2 = acc2 + jnp.dot(tap.astype(compute_dtype),
                                  w2_ref[off + pad_l],
                                  preferred_element_type=jnp.float32)
        y = acc2 + b2_ref[...]

        o_ref[0] = (y * mk[halo: halo + tile_t, :]).astype(o_ref.dtype)

    return kernel


# ---------------------------------------------------------------------------
# Wrapper: same semantics as FeedForwardNetwork.forward
# ---------------------------------------------------------------------------
def feed_forward_network_forward(x, x_mask, params, *, kernel_size,
                                 causal=False, activation=None,
                                 compute_dtype=jnp.bfloat16,
                                 out_dtype=jnp.bfloat16,
                                 lane=128, tile_t=512,
                                 vmem_limit_bytes=64 * 1024 * 1024):
    """x: [B, C_in, T] (torch NCT), x_mask: [B, 1, T] -> [B, C_out, T].

    tile_t: time-tile rows (use ~512 on v5e/v6e, ~256 on v7x's 64 MiB VMEM).
    """
    w1, b1, w2, b2 = params["w1"], params["b1"], params["w2"], params["b2"]
    F_ch, C_in, ks = w1.shape
    C_out = w2.shape[0]
    assert ks == kernel_size and w2.shape == (C_out, F_ch, kernel_size)
    B, _, T = x.shape

    pad_l, pad_r = _conv_pads(kernel_size, causal)

    Ci_p = _round_up(C_in, lane)
    F_p = _round_up(F_ch, lane)
    Co_p = _round_up(C_out, lane)

    # Halo rows needed per side for the two stacked convs, as a sublane multiple.
    halo = max(8, _round_up(max(2 * pad_l, 2 * pad_r, 1), 8))
    tile = min(tile_t, _round_up(T, 8))
    tile = _round_up(tile, halo)
    assert tile % halo == 0
    T_r = _round_up(T, tile)
    nT = T_r // tile
    tpb = tile // halo                  # halo blocks per tile
    n_hb = T_r // halo                  # halo blocks in the whole sequence

    # HBM-side prep in bf16 (half the DMA bytes of the old f32 path).
    xt = jnp.transpose(x, (0, 2, 1)).astype(compute_dtype)          # [B, T, Cin]
    xt = jnp.pad(xt, ((0, 0), (0, T_r - T), (0, Ci_p - C_in)))
    m_col = jnp.transpose(x_mask, (0, 2, 1)).astype(jnp.float32)    # [B, T, 1]
    m_col = jnp.pad(m_col, ((0, 0), (0, T_r - T), (0, 0)))

    # Weights packed per tap: wp[j, ci, co] = w[co, ci, j]  (zero lane padding).
    def pack_w(w, cin_p, cout_p):
        cout, cin, _ = w.shape
        wp = jnp.zeros((kernel_size, cin_p, cout_p), jnp.float32)
        wp = wp.at[:, :cin, :cout].set(jnp.transpose(w, (2, 1, 0)))
        return wp.astype(compute_dtype)

    w1p = pack_w(w1, Ci_p, F_p)
    w2p = pack_w(w2, F_p, Co_p)
    b1p = jnp.zeros((1, F_p), jnp.float32).at[0, :F_ch].set(b1)
    b2p = jnp.zeros((1, Co_p), jnp.float32).at[0, :C_out].set(b2)

    kernel = make_ffn_kernel(kernel_size, causal, activation, tile, halo, T_r,
                             F_p, Co_p, compute_dtype)

    # x / mask are passed three times: current tile plus clamped left/right halo
    # blocks (halo-sized DMAs), so the T grid axis stays fully "parallel".
    def left_map(b, i):
        return (b, jnp.maximum(i * tpb - 1, 0), 0)

    def right_map(b, i):
        return (b, jnp.minimum((i + 1) * tpb, n_hb - 1), 0)

    out = pl.pallas_call(
        kernel,
        out_shape=jax.ShapeDtypeStruct((B, T_r, Co_p), out_dtype),
        grid=(B, nT),
        in_specs=[
            pl.BlockSpec((1, halo, Ci_p), left_map),                   # x left halo
            pl.BlockSpec((1, tile, Ci_p), lambda b, i: (b, i, 0)),     # x tile
            pl.BlockSpec((1, halo, Ci_p), right_map),                  # x right halo
            pl.BlockSpec((1, halo, 1), left_map),                      # mask left
            pl.BlockSpec((1, tile, 1), lambda b, i: (b, i, 0)),        # mask tile
            pl.BlockSpec((1, halo, 1), right_map),                     # mask right
            pl.BlockSpec((kernel_size, Ci_p, F_p), lambda b, i: (0, 0, 0)),  # W1
            pl.BlockSpec((1, F_p), lambda b, i: (0, 0)),               # b1
            pl.BlockSpec((kernel_size, F_p, Co_p), lambda b, i: (0, 0, 0)),  # W2
            pl.BlockSpec((1, Co_p), lambda b, i: (0, 0)),              # b2
        ],
        out_specs=pl.BlockSpec((1, tile, Co_p), lambda b, i: (b, i, 0)),
        compiler_params=pltpu.CompilerParams(
            dimension_semantics=("parallel", "parallel"),
            vmem_limit_bytes=vmem_limit_bytes),
    )(xt, xt, xt, m_col, m_col, m_col, w1p, b1p, w2p, b2p)

    out = out[:, :T, :C_out]                 # drop time / lane padding
    return jnp.transpose(out, (0, 2, 1))     # back to [B, C_out, T]


# ---------------------------------------------------------------------------
# Pure-JAX reference (matches PyTorch module semantics) + param init
# ---------------------------------------------------------------------------
def ffn_reference(x, x_mask, params, *, kernel_size, causal=False, activation=None):
    w1, b1, w2, b2 = params["w1"], params["b1"], params["w2"], params["b2"]

    def pad(z):
        if kernel_size == 1:
            return z
        p_l, p_r = _conv_pads(kernel_size, causal)
        return jnp.pad(z, ((0, 0), (0, 0), (p_l, p_r)))

    def conv1d(z, w, b):
        out = jax.lax.conv_general_dilated(
            z, w, window_strides=(1,), padding="VALID",
            dimension_numbers=("NCH", "OIH", "NCH"))
        return out + b[None, :, None]

    h = conv1d(pad(x * x_mask), w1, b1)
    if activation == "gelu":
        h = h * jax.nn.sigmoid(1.702 * h)
    else:
        h = jnp.maximum(h, 0.0)
    h = conv1d(pad(h * x_mask), w2, b2)
    return h * x_mask


def init_params(key, in_channels, out_channels, filter_channels, kernel_size):
    k1, k2, k3, k4 = jax.random.split(key, 4)
    lim1 = math.sqrt(1.0 / (in_channels * kernel_size))
    lim2 = math.sqrt(1.0 / (filter_channels * kernel_size))
    return dict(
        w1=jax.random.uniform(k1, (filter_channels, in_channels, kernel_size),
                              jnp.float32, -lim1, lim1),
        b1=jax.random.uniform(k2, (filter_channels,), jnp.float32, -lim1, lim1),
        w2=jax.random.uniform(k3, (out_channels, filter_channels, kernel_size),
                              jnp.float32, -lim2, lim2),
        b2=jax.random.uniform(k4, (out_channels,), jnp.float32, -lim2, lim2),
    )


# ---------------------------------------------------------------------------
if __name__ == "__main__":
    B, C_IN, C_OUT, FILTER, KS, T = 2, 32, 48, 64, 3, 16

    key = jax.random.PRNGKey(0)
    kx, kp, kp2 = jax.random.split(key, 3)

    x = jax.random.normal(kx, (B, C_IN, T), jnp.float32)
    lengths = jnp.array([T, 11], dtype=jnp.int32)
    x_mask = (jnp.arange(T)[None, :] < lengths[:, None]).astype(jnp.float32)[:, None, :]

    # --- config 1: relu activation, "same" padding (module defaults) ---
    params = init_params(kp, C_IN, C_OUT, FILTER, KS)
    ref = ffn_reference(x, x_mask, params, kernel_size=KS, causal=False, activation=None)

    out = feed_forward_network_forward(
        x, x_mask, params, kernel_size=KS, causal=False, activation=None)
    out = jax.block_until_ready(out).astype(jnp.float32)
    assert out.shape == (B, C_OUT, T)
    assert bool(jnp.all(jnp.isfinite(out)))
    assert bool(jnp.all(out[1, :, 11:] == 0.0))          # padded frames zeroed
    err = float(jnp.max(jnp.abs(out - ref)))
    assert err < 3e-2, err

    # --- config 1b: same params, but force multiple time tiles (halo path) ---
    out_mt = feed_forward_network_forward(
        x, x_mask, params, kernel_size=KS, causal=False, activation=None, tile_t=8)
    out_mt = jax.block_until_ready(out_mt).astype(jnp.float32)
    err_mt = float(jnp.max(jnp.abs(out_mt - ref)))
    assert err_mt < 3e-2, err_mt

    # --- config 2: gelu activation, causal padding, kernel_size = 5 ---
    KS2 = 5
    params2 = init_params(kp2, C_IN, C_OUT, FILTER, KS2)
    ref2 = ffn_reference(x, x_mask, params2, kernel_size=KS2, causal=True, activation="gelu")

    out2 = feed_forward_network_forward(
        x, x_mask, params2, kernel_size=KS2, causal=True, activation="gelu")
    out2 = jax.block_until_ready(out2).astype(jnp.float32)
    assert out2.shape == (B, C_OUT, T)
    assert bool(jnp.all(jnp.isfinite(out2)))
    err2 = float(jnp.max(jnp.abs(out2 - ref2)))
    assert err2 < 3e-2, err2

    print("KERNEL_OK")
</pallas_src>

<mosaic_0001>
module attributes {stable_mosaic.version = 11 : i64} {
  func.func @kernel(%arg0: i32, %arg1: i32, %arg2: memref<1x8x128xbf16, #tpu.memory_space<vmem>>, %arg3: memref<1x16x128xbf16, #tpu.memory_space<vmem>>, %arg4: memref<1x8x128xbf16, #tpu.memory_space<vmem>>, %arg5: memref<1x8x1xf32, #tpu.memory_space<vmem>>, %arg6: memref<1x16x1xf32, #tpu.memory_space<vmem>>, %arg7: memref<1x8x1xf32, #tpu.memory_space<vmem>>, %arg8: memref<3x128x128xbf16, #tpu.memory_space<vmem>>, %arg9: memref<1x128xf32, #tpu.memory_space<vmem>>, %arg10: memref<3x128x128xbf16, #tpu.memory_space<vmem>>, %arg11: memref<1x128xf32, #tpu.memory_space<vmem>>, %arg12: memref<1x16x128xbf16, #tpu.memory_space<vmem>>) attributes {dimension_semantics = [#tpu.dimension_semantics<parallel>, #tpu.dimension_semantics<parallel>], iteration_bounds = array<i64: 2, 1>, scalar_prefetch = 0 : i64, scratch_operands = 0 : i64, tpu.core_type = #tpu.core_type<tc>, window_params = [{transform_indices = @transform_0, window_bounds = array<i64: 1, 8, 128>}, {transform_indices = @transform_1, window_bounds = array<i64: 1, 16, 128>}, {transform_indices = @transform_2, window_bounds = array<i64: 1, 8, 128>}, {transform_indices = @transform_3, window_bounds = array<i64: 1, 8, 1>}, {transform_indices = @transform_4, window_bounds = array<i64: 1, 16, 1>}, {transform_indices = @transform_5, window_bounds = array<i64: 1, 8, 1>}, {pipeline_mode = #tpu.pipeline_mode<synchronous>, transform_indices = @transform_6, window_bounds = array<i64: 3, 128, 128>}, {pipeline_mode = #tpu.pipeline_mode<synchronous>, transform_indices = @transform_7, window_bounds = array<i64: 1, 128>}, {pipeline_mode = #tpu.pipeline_mode<synchronous>, transform_indices = @transform_8, window_bounds = array<i64: 3, 128, 128>}, {pipeline_mode = #tpu.pipeline_mode<synchronous>, transform_indices = @transform_9, window_bounds = array<i64: 1, 128>}, {transform_indices = @transform_10, window_bounds = array<i64: 1, 16, 128>}]} {
    %c16_i32 = arith.constant 16 : i32
    %0 = arith.muli %arg1, %c16_i32 : i32
    %c0 = arith.constant 0 : index
    %c0_0 = arith.constant 0 : index
    %c0_1 = arith.constant 0 : index
    %1 = vector.load %arg2[%c0, %c0_0, %c0_1] : memref<1x8x128xbf16, #tpu.memory_space<vmem>>, vector<1x8x128xbf16>
    %2 = vector.shape_cast %1 : vector<1x8x128xbf16> to vector<8x128xbf16>
    %c0_2 = arith.constant 0 : index
    %c0_3 = arith.constant 0 : index
    %c0_4 = arith.constant 0 : index
    %3 = vector.load %arg3[%c0_2, %c0_3, %c0_4] : memref<1x16x128xbf16, #tpu.memory_space<vmem>>, vector<1x16x128xbf16>
    %4 = vector.shape_cast %3 : vector<1x16x128xbf16> to vector<16x128xbf16>
    %c0_5 = arith.constant 0 : index
    %c0_6 = arith.constant 0 : index
    %c0_7 = arith.constant 0 : index
    %5 = vector.load %arg4[%c0_5, %c0_6, %c0_7] : memref<1x8x128xbf16, #tpu.memory_space<vmem>>, vector<1x8x128xbf16>
    %6 = vector.shape_cast %5 : vector<1x8x128xbf16> to vector<8x128xbf16>
    %7 = tpu.concatenate %2, %4, %6 in 0 : vector<8x128xbf16>, vector<16x128xbf16>, vector<8x128xbf16> -> vector<32x128xbf16>
    %8 = arith.extf %7 : vector<32x128xbf16> to vector<32x128xf32>
    %c0_8 = arith.constant 0 : index
    %c0_9 = arith.constant 0 : index
    %c0_10 = arith.constant 0 : index
    %9 = vector.load %arg5[%c0_8, %c0_9, %c0_10] : memref<1x8x1xf32, #tpu.memory_space<vmem>>, vector<1x8x1xf32>
    %10 = vector.shape_cast %9 : vector<1x8x1xf32> to vector<8x1xf32>
    %c0_11 = arith.constant 0 : index
    %c0_12 = arith.constant 0 : index
    %c0_13 = arith.constant 0 : index
    %11 = vector.load %arg6[%c0_11, %c0_12, %c0_13] : memref<1x16x1xf32, #tpu.memory_space<vmem>>, vector<1x16x1xf32>
    %12 = vector.shape_cast %11 : vector<1x16x1xf32> to vector<16x1xf32>
    %c0_14 = arith.constant 0 : index
    %c0_15 = arith.constant 0 : index
    %c0_16 = arith.constant 0 : index
    %13 = vector.load %arg7[%c0_14, %c0_15, %c0_16] : memref<1x8x1xf32, #tpu.memory_space<vmem>>, vector<1x8x1xf32>
    %14 = vector.shape_cast %13 : vector<1x8x1xf32> to vector<8x1xf32>
    %15 = tpu.concatenate %10, %12, %14 in 0 : vector<8x1xf32>, vector<16x1xf32>, vector<8x1xf32> -> vector<32x1xf32>
    %c8_i32 = arith.constant 8 : i32
    %16 = arith.subi %0, %c8_i32 : i32
    %17 = tpu.iota {dimensions = array<i32: 0>} : vector<32x1xi32>
    %18 = vector.broadcast %16 : i32 to vector<32x1xi32>
    %19 = arith.addi %18, %17 : vector<32x1xi32>
    %c0_i32 = arith.constant 0 : i32
    %20 = vector.broadcast %c0_i32 : i32 to vector<32x1xi32>
    %21 = arith.cmpi sge, %19, %20 : vector<32x1xi32>
    %c16_i32_17 = arith.constant 16 : i32
    %22 = vector.broadcast %c16_i32_17 : i32 to vector<32x1xi32>
    %23 = arith.cmpi slt, %19, %22 : vector<32x1xi32>
    %24 = arith.andi %21, %23 : vector<32x1xi1>
    %25 = arith.extui %24 : vector<32x1xi1> to vector<32x1xi32>
    %26 = arith.sitofp %25 : vector<32x1xi32> to vector<32x1xf32>
    %27 = arith.mulf %15, %26 : vector<32x1xf32>
    %28 = vector.broadcast %27 : vector<32x1xf32> to vector<32x128xf32>
    %29 = arith.mulf %8, %28 : vector<32x128xf32>
    %cst = arith.constant 0.000000e+00 : f32
    %30 = vector.broadcast %cst : f32 to vector<32x128xf32>
    %c1_i32 = arith.constant 1 : i32
    %31 = tpu.dynamic_rotate %29 by %c1_i32 dim 0 : vector<32x128xf32>, i32 -> vector<32x128xf32>
    %32 = arith.truncf %31 : vector<32x128xf32> to vector<32x128xbf16>
    %c0_18 = arith.constant 0 : index
    %c0_19 = arith.constant 0 : index
    %c0_20 = arith.constant 0 : index
    %33 = vector.load %arg8[%c0_18, %c0_19, %c0_20] : memref<3x128x128xbf16, #tpu.memory_space<vmem>>, vector<1x128x128xbf16>
    %34 = vector.shape_cast %33 : vector<1x128x128xbf16> to vector<128x128xbf16>
    %cst_21 = arith.constant dense<0.000000e+00> : vector<32x128xf32>
    %35 = tpu.matmul %32, %34, %cst_21 {dimension_numbers = #tpu.dot_dimension_numbers<[1], [0], [0], [1], [0, 0, 1, 1], [], []>} : vector<32x128xbf16>, vector<128x128xbf16>, vector<32x128xf32> -> vector<32x128xf32>
    %36 = arith.addf %30, %35 : vector<32x128xf32>
    %37 = arith.truncf %29 : vector<32x128xf32> to vector<32x128xbf16>
    %c1 = arith.constant 1 : index
    %c0_22 = arith.constant 0 : index
    %c0_23 = arith.constant 0 : index
    %38 = vector.load %arg8[%c1, %c0_22, %c0_23] : memref<3x128x128xbf16, #tpu.memory_space<vmem>>, vector<1x128x128xbf16>
    %39 = vector.shape_cast %38 : vector<1x128x128xbf16> to vector<128x128xbf16>
    %cst_24 = arith.constant dense<0.000000e+00> : vector<32x128xf32>
    %40 = tpu.matmul %37, %39, %cst_24 {dimension_numbers = #tpu.dot_dimension_numbers<[1], [0], [0], [1], [0, 0, 1, 1], [], []>} : vector<32x128xbf16>, vector<128x128xbf16>, vector<32x128xf32> -> vector<32x128xf32>
    %41 = arith.addf %36, %40 : vector<32x128xf32>
    %c31_i32 = arith.constant 31 : i32
    %42 = tpu.dynamic_rotate %29 by %c31_i32 dim 0 : vector<32x128xf32>, i32 -> vector<32x128xf32>
    %43 = arith.truncf %42 : vector<32x128xf32> to vector<32x128xbf16>
    %c2 = arith.constant 2 : index
    %c0_25 = arith.constant 0 : index
    %c0_26 = arith.constant 0 : index
    %44 = vector.load %arg8[%c2, %c0_25, %c0_26] : memref<3x128x128xbf16, #tpu.memory_space<vmem>>, vector<1x128x128xbf16>
    %45 = vector.shape_cast %44 : vector<1x128x128xbf16> to vector<128x128xbf16>
    %cst_27 = arith.constant dense<0.000000e+00> : vector<32x128xf32>
    %46 = tpu.matmul %43, %45, %cst_27 {dimension_numbers = #tpu.dot_dimension_numbers<[1], [0], [0], [1], [0, 0, 1, 1], [], []>} : vector<32x128xbf16>, vector<128x128xbf16>, vector<32x128xf32> -> vector<32x128xf32>
    %47 = arith.addf %41, %46 : vector<32x128xf32>
    %c0_28 = arith.constant 0 : index
    %c0_29 = arith.constant 0 : index
    %48 = vector.load %arg9[%c0_28, %c0_29] : memref<1x128xf32, #tpu.memory_space<vmem>>, vector<1x128xf32>
    %49 = vector.broadcast %48 : vector<1x128xf32> to vector<32x128xf32>
    %50 = arith.addf %47, %49 : vector<32x128xf32>
    %cst_30 = arith.constant 0.000000e+00 : f32
    %51 = vector.broadcast %cst_30 : f32 to vector<32x128xf32>
    %52 = arith.maximumf %50, %51 : vector<32x128xf32>
    %53 = vector.broadcast %27 : vector<32x1xf32> to vector<32x128xf32>
    %54 = arith.mulf %52, %53 : vector<32x128xf32>
    %cst_31 = arith.constant 0.000000e+00 : f32
    %55 = vector.broadcast %cst_31 : f32 to vector<16x128xf32>
    %56 = vector.extract_strided_slice %54 {offsets = [7, 0], sizes = [16, 128], strides = [1, 1]} : vector<32x128xf32> to vector<16x128xf32>
    %57 = arith.truncf %56 : vector<16x128xf32> to vector<16x128xbf16>
    %c0_32 = arith.constant 0 : index
    %c0_33 = arith.constant 0 : index
    %c0_34 = arith.constant 0 : index
    %58 = vector.load %arg10[%c0_32, %c0_33, %c0_34] : memref<3x128x128xbf16, #tpu.memory_space<vmem>>, vector<1x128x128xbf16>
    %59 = vector.shape_cast %58 : vector<1x128x128xbf16> to vector<128x128xbf16>
    %cst_35 = arith.constant dense<0.000000e+00> : vector<16x128xf32>
    %60 = tpu.matmul %57, %59, %cst_35 {dimension_numbers = #tpu.dot_dimension_numbers<[1], [0], [0], [1], [0, 0, 1, 1], [], []>} : vector<16x128xbf16>, vector<128x128xbf16>, vector<16x128xf32> -> vector<16x128xf32>
    %61 = arith.addf %55, %60 : vector<16x128xf32>
    %62 = vector.extract_strided_slice %54 {offsets = [8, 0], sizes = [16, 128], strides = [1, 1]} : vector<32x128xf32> to vector<16x128xf32>
    %63 = arith.truncf %62 : vector<16x128xf32> to vector<16x128xbf16>
    %c1_36 = arith.constant 1 : index
    %c0_37 = arith.constant 0 : index
    %c0_38 = arith.constant 0 : index
    %64 = vector.load %arg10[%c1_36, %c0_37, %c0_38] : memref<3x128x128xbf16, #tpu.memory_space<vmem>>, vector<1x128x128xbf16>
    %65 = vector.shape_cast %64 : vector<1x128x128xbf16> to vector<128x128xbf16>
    %cst_39 = arith.constant dense<0.000000e+00> : vector<16x128xf32>
    %66 = tpu.matmul %63, %65, %cst_39 {dimension_numbers = #tpu.dot_dimension_numbers<[1], [0], [0], [1], [0, 0, 1, 1], [], []>} : vector<16x128xbf16>, vector<128x128xbf16>, vector<16x128xf32> -> vector<16x128xf32>
    %67 = arith.addf %61, %66 : vector<16x128xf32>
    %68 = vector.extract_strided_slice %54 {offsets = [9, 0], sizes = [16, 128], strides = [1, 1]} : vector<32x128xf32> to vector<16x128xf32>
    %69 = arith.truncf %68 : vector<16x128xf32> to vector<16x128xbf16>
    %c2_40 = arith.constant 2 : index
    %c0_41 = arith.constant 0 : index
    %c0_42 = arith.constant 0 : index
    %70 = vector.load %arg10[%c2_40, %c0_41, %c0_42] : memref<3x128x128xbf16, #tpu.memory_space<vmem>>, vector<1x128x128xbf16>
    %71 = vector.shape_cast %70 : vector<1x128x128xbf16> to vector<128x128xbf16>
    %cst_43 = arith.constant dense<0.000000e+00> : vector<16x128xf32>
    %72 = tpu.matmul %69, %71, %cst_43 {dimension_numbers = #tpu.dot_dimension_numbers<[1], [0], [0], [1], [0, 0, 1, 1], [], []>} : vector<16x128xbf16>, vector<128x128xbf16>, vector<16x128xf32> -> vector<16x128xf32>
    %73 = arith.addf %67, %72 : vector<16x128xf32>
    %c0_44 = arith.constant 0 : index
    %c0_45 = arith.constant 0 : index
    %74 = vector.load %arg11[%c0_44, %c0_45] : memref<1x128xf32, #tpu.memory_space<vmem>>, vector<1x128xf32>
    %75 = vector.broadcast %74 : vector<1x128xf32> to vector<16x128xf32>
    %76 = arith.addf %73, %75 : vector<16x128xf32>
    %77 = vector.extract_strided_slice %27 {offsets = [8, 0], sizes = [16, 1], strides = [1, 1]} : vector<32x1xf32> to vector<16x1xf32>
    %78 = vector.broadcast %77 : vector<16x1xf32> to vector<16x128xf32>
    %79 = arith.mulf %76, %78 : vector<16x128xf32>
    %80 = arith.truncf %79 : vector<16x128xf32> to vector<16x128xbf16>
    %c0_46 = arith.constant 0 : index
    %c0_47 = arith.constant 0 : index
    %c0_48 = arith.constant 0 : index
    %81 = vector.load %arg12[%c0_46, %c0_47, %c0_48] : memref<1x16x128xbf16, #tpu.memory_space<vmem>>, vector<1x16x128xbf16>
    %82 = vector.shape_cast %81 : vector<1x16x128xbf16> to vector<16x128xbf16>
    %83 = vector.shape_cast %80 : vector<16x128xbf16> to vector<1x16x128xbf16>
    tpu.vector_store %arg12[%c0_46, %c0_47, %c0_48], %83 {strides = array<i32>} : memref<1x16x128xbf16, #tpu.memory_space<vmem>>, vector<1x16x128xbf16>,
    return
  }
  func.func @transform_0(%arg0: i32, %arg1: i32) -> (i32, i32, i32) {
    %c2_i32 = arith.constant 2 : i32
    %0 = arith.muli %arg1, %c2_i32 : i32
    %c1_i32 = arith.constant 1 : i32
    %1 = arith.subi %0, %c1_i32 : i32
    %c0_i32 = arith.constant 0 : i32
    %2 = arith.maxsi %1, %c0_i32 : i32
    %c0_i32_0 = arith.constant 0 : i32
    %c0_i32_1 = arith.constant 0 : i32
    return %arg0, %2, %c0_i32_0 : i32, i32, i32
  }
  func.func @transform_1(%arg0: i32, %arg1: i32) -> (i32, i32, i32) {
    %c0_i32 = arith.constant 0 : i32
    %c0_i32_0 = arith.constant 0 : i32
    return %arg0, %arg1, %c0_i32 : i32, i32, i32
  }
  func.func @transform_2(%arg0: i32, %arg1: i32) -> (i32, i32, i32) {
    %c1_i32 = arith.constant 1 : i32
    %0 = arith.addi %arg1, %c1_i32 : i32
    %c2_i32 = arith.constant 2 : i32
    %1 = arith.muli %0, %c2_i32 : i32
    %c1_i32_0 = arith.constant 1 : i32
    %2 = arith.minsi %1, %c1_i32_0 : i32
    %c0_i32 = arith.constant 0 : i32
    %c0_i32_1 = arith.constant 0 : i32
    return %arg0, %2, %c0_i32 : i32, i32, i32
  }
  func.func @transform_3(%arg0: i32, %arg1: i32) -> (i32, i32, i32) {
    %c2_i32 = arith.constant 2 : i32
    %0 = arith.muli %arg1, %c2_i32 : i32
    %c1_i32 = arith.constant 1 : i32
    %1 = arith.subi %0, %c1_i32 : i32
    %c0_i32 = arith.constant 0 : i32
    %2 = arith.maxsi %1, %c0_i32 : i32
    %c0_i32_0 = arith.constant 0 : i32
    %c0_i32_1 = arith.constant 0 : i32
    return %arg0, %2, %c0_i32_0 : i32, i32, i32
  }
  func.func @transform_4(%arg0: i32, %arg1: i32) -> (i32, i32, i32) {
    %c0_i32 = arith.constant 0 : i32
    %c0_i32_0 = arith.constant 0 : i32
    return %arg0, %arg1, %c0_i32 : i32, i32, i32
  }
  func.func @transform_5(%arg0: i32, %arg1: i32) -> (i32, i32, i32) {
    %c1_i32 = arith.constant 1 : i32
    %0 = arith.addi %arg1, %c1_i32 : i32
    %c2_i32 = arith.constant 2 : i32
    %1 = arith.muli %0, %c2_i32 : i32
    %c1_i32_0 = arith.constant 1 : i32
    %2 = arith.minsi %1, %c1_i32_0 : i32
    %c0_i32 = arith.constant 0 : i32
    %c0_i32_1 = arith.constant 0 : i32
    return %arg0, %2, %c0_i32 : i32, i32, i32
  }
  func.func @transform_6(%arg0: i32, %arg1: i32) -> (i32, i32, i32) {
    %c0_i32 = arith.constant 0 : i32
    %c0_i32_0 = arith.constant 0 : i32
    %c0_i32_1 = arith.constant 0 : i32
    %c0_i32_2 = arith.constant 0 : i32
    return %c0_i32, %c0_i32_0, %c0_i32_1 : i32, i32, i32
  }
  func.func @transform_7(%arg0: i32, %arg1: i32) -> (i32, i32) {
    %c0_i32 = arith.constant 0 : i32
    %c0_i32_0 = arith.constant 0 : i32
    %c0_i32_1 = arith.constant 0 : i32
    return %c0_i32, %c0_i32_0 : i32, i32
  }
  func.func @transform_8(%arg0: i32, %arg1: i32) -> (i32, i32, i32) {
    %c0_i32 = arith.constant 0 : i32
    %c0_i32_0 = arith.constant 0 : i32
    %c0_i32_1 = arith.constant 0 : i32
    %c0_i32_2 = arith.constant 0 : i32
    return %c0_i32, %c0_i32_0, %c0_i32_1 : i32, i32, i32
  }
  func.func @transform_9(%arg0: i32, %arg1: i32) -> (i32, i32) {
    %c0_i32 = arith.constant 0 : i32
    %c0_i32_0 = arith.constant 0 : i32
    %c0_i32_1 = arith.constant 0 : i32
    return %c0_i32, %c0_i32_0 : i32, i32
  }
  func.func @transform_10(%arg0: i32, %arg1: i32) -> (i32, i32, i32) {
    %c0_i32 = arith.constant 0 : i32
    %c0_i32_0 = arith.constant 0 : i32
    return %arg0, %arg1, %c0_i32 : i32, i32, i32
  }
}

</mosaic_0001>

<bundles_post_ra>
// kernel: tpu_custom_call.1
= control target key start
LH: loop header
LB: loop body
LE: loop exit
PB: predicated region body
PF: predicated region fallthrough
CT: control target
= control target key end

     0   :  { %s3396_s0 = inlined_call_operand.hbm [shape: bf16[2,16,128], index: 0, kind: input, shape index: {}]   ;;  %s3397_s1 = inlined_call_operand.hbm [shape: bf16[2,16,128], index: 1, kind: input, shape index: {}]   ;;  %s3398_s2 = inlined_call_operand.hbm [shape: bf16[2,16,128], index: 2, kind: input, shape index: {}]   ;;  %s3399_s3 = inlined_call_operand.hbm [shape: f32[2,16,1], index: 3, kind: input, shape index: {}]   ;;  %s3400_s4 = inlined_call_operand.hbm [shape: f32[2,16,1], index: 4, kind: input, shape index: {}]   ;;  %s3401_s5 = inlined_call_operand.hbm [shape: f32[2,16,1], index: 5, kind: input, shape index: {}]   ;;  %s3402_s6 = inlined_call_operand.hbm [shape: bf16[3,128,128], index: 6, kind: input, shape index: {}]   ;;  %s3403_s7 = inlined_call_operand.hbm [shape: f32[1,128], index: 7, kind: input, shape index: {}]   ;;  %s3404_s8 = inlined_call_operand.hbm [shape: bf16[3,128,128], index: 8, kind: input, shape index: {}]   ;;  %s3405_s9 = inlined_call_operand.hbm [shape: f32[1,128], index: 9, kind: input, shape index: {}]   ;;  %s3406_s10 = inlined_call_operand.hbm [shape: bf16[2,16,128], index: 10, kind: output, shape index: {}]  }
   0x1   :  { %3438 = sst [smem:[#allocation41_spill]] %s3397_s1 }
   0x2   :  { %3439 = sst [smem:[#allocation42_spill]] %s3399_s3 }
   0x3   :  { %3440 = sst [smem:[#allocation43_spill]] %s3402_s6 }
   0x4   :  { %3441 = sst [smem:[#allocation44_spill]] %s3403_s7 }
   0x5   :  { %3442 = sst [smem:[#allocation45_spill]] %s3406_s10 }
   0x6   :  { %15 = vsyncpa [#allocation3], 0 }
   0x7   :  { %17 = vsyncpa [#allocation3 + $0x1], 0 }
   0x8   :  { %18 = vsyncpa [#allocation6], 0 }
   0x9   :  { %20 = vsyncpa [#allocation6 + $0x1], 0 }
   0xa   :  { %21 = vsyncpa [#allocation9], 0 }
   0xb   :  { %23 = vsyncpa [#allocation9 + $0x1], 0 }
   0xc   :  { %24 = vsyncpa [#allocation12], 0 }
   0xd   :  { %26 = vsyncpa [#allocation12 + $0x1], 0 }
   0xe   :  { %27 = vsyncpa [#allocation15], 0 }
   0xf   :  { %28 = vsyncpa [#allocation18], 0 }
  0x10   :  { %29 = vsyncpa [#allocation4], 0 }
  0x11   :  { %31 = vsyncpa [#allocation4 + $0x1], 0  ;;  %s2802_s13 = smov 0   ;;  %s2804_s14 = smov 0  }
  0x12   :  { %s2806_s15 = smov 0   ;;  %s2808_s16 = smov 0  }
  0x13   :  { %s2810_s17 = smov 0   ;;  %s2812_s18 = smov 0  }
  0x14 LB: > { %3443 = sst [smem:[#allocation28_spill]] %s2705_s13  ;;  %s2833_s19 = sadd.s32 4294967295, %s2725_s18   ;;  %s2725_s18 = sphi %s2812_s18, %s37_s18   ;;  %s2721_s17 = sphi %s2810_s17, %s3503_s17   ;;  %s2717_s16 = sphi %s2808_s16, %s3502_s16   ;;  %s2713_s15 = sphi %s2806_s15, %s3501_s15   ;;  %s2709_s14 = sphi %s2804_s14, %s3500_s14   ;;  %s2705_s13 = sphi %s2802_s13, %s3499_s13  }
  0x15   : > { %3444 = sst [smem:[#allocation29_spill]] %s2709_s14  ;;  %s1837_s20 = sadd.s32 4294967294, %s2725_s18  }
  0x16   : > { %3445 = sst [smem:[#allocation30_spill]] %s2713_s15  ;;  %p79_p0 = scmp.ne.s32.totalorder %s2709_s14, %s2705_s13 }
  0x17   : > { %3446 = sst [smem:[#allocation31_spill]] %s2717_s16  ;;  %p3408_p1 = scmp.eq.s32.totalorder %s2833_s19, 0 }
  0x18   : > { %3447 = sst [smem:[#allocation32_spill]] %s2721_s17  ;;  %p359_p3 = scmp.eq.s32.totalorder %s1837_s20, 1 }
  0x19   : > { %3448 = sst [smem:[#allocation33_spill]] %s2725_s18  ;;  %p2842_p4 = por %p3408_p1, %p79_p0 }
  0x1a   : > { %3449 = sst [smem:[#allocation34_spill]] %s2833_s19  ;;  %p1838_p5 = scmp.ge.s32.totalorder %s2725_s18, 1 }
  0x1b   : > { %s3450_s21 = scalar_select %p2842_p4, 1, 0 }
  0x1c   : > { %p2847_p6 = por %p359_p3, %p79_p0  ;;  %p366_p7 = scmp.lt.s32.totalorder %s2725_s18, 3 }
  0x1d   : > { %3451 = sst [smem:[#allocation35_spill]] %s3450_s21  ;;  %s2727_s24 = smov [#allocation13]  }
  0x1e   : > { %s3452_s22 = scalar_select %p2847_p6, 1, 0 }
  0x1f   : > { %p2852_p8 = pnand %p1838_p5, %p366_p7  ;;  %s378_s25 = sshll.u32 %s2727_s24, 4  ;;  %s2856_s25 = int_to_ptr.vmem [resolvable:$true] %s378_s25 }
  0x20   : > { %3453 = sst [smem:[#allocation36_spill]] %s3452_s22  ;;  %s2728_s27 = smov [#allocation14]  }
  0x21   : > { %s3454_s23 = scalar_select %p2852_p8, 1, 0 }
  0x22   : > { %p2167_p9 = pneg %p2852_p8  ;;  %s392_s28 = sshll.u32 %s2728_s27, 4  ;;  %s2867_s28 = int_to_ptr.vmem [resolvable:$true] %s392_s28 }
  0x23   : > { %3455 = sst [smem:[#allocation37_spill]] %s3454_s23  ;;  %s3457_s6 = sld [smem:[#allocation43_spill]] }
  0x24   : > { %p2863_p11 = pnand %p2167_p9, %p3408_p1 }
  0x26   : > { %s3456_s26 = scalar_select %p2863_p11, 1, 0 }
  0x27   : > { %p2877_p13 = pneg %p2863_p11 }
  0x29   : > { %s2327_s11 = scalar_lea.hbm %s3457_s6, 3072 }
  0x2a   : > { %p2328_p12 = scmp.ne.s32.totalorder %s3457_s6, %s2327_s11  ;;  %p2334_p5 = scmp.lt.u32.totalorder %s2327_s11, %s3457_s6 }
  0x2b   : > { %s3458_s24 = scalar_select %p2877_p13, 1, 0 }
  0x2c   : > { %p2330_p0 = pnand %p2877_p13, %p2328_p12 }
  0x2e   : > { %p2331_p3 = pneg %p2330_p0 }
  0x30   : > { %p2336_p7 = pnand %p2334_p5, %p2331_p3 }
  0x32   : > { %2339 = shalt.err (!%p2336_p7)
}
  0x33   : > { %s2340_s29 = scalar_lea.vmem %s2856_s25, 3072  ;;  %p2348_p2 = scmp.lt.s32.totalorder %s2856_s25, %s2856_s25 }
  0x34   : > { %p2341_p9 = scmp.ne.s32.totalorder %s2856_s25, %s2340_s29  ;;  %p2349_p6 = scmp.lt.s32.totalorder %s2340_s29, %s2340_s29 }
  0x36   : > { %p2343_p10 = pnand %p2341_p9, %p2877_p13  ;;  %p2350_p12 = por %p2349_p6, %p2348_p2 }
  0x38   : > { %p2344_p1 = pneg %p2343_p10 }
  0x3a   : > { %p2351_p0 = pnand %p2350_p12, %p2344_p1 }
  0x3c   : > { %2354 = shalt.err (!%p2351_p0)
}
  0x3d   : > { %s3413_s30 = smov 64   ;;  %s3415_s22 = smov 4  }
  0x3e   : > { %2170 = dma.hbm_to_vmem [thread:$0]  (!%p2863_p11), %s3457_s6, 3072, %s2856_s25, [#allocation12], %s3413_s30, %s3413_s30, %s3415_s22  }
  0x3f   : > { %s3459_s7 = sld [smem:[#allocation44_spill]] }
  0x45   : > { %s2355_s29 = scalar_lea.hbm %s3459_s7, 16 }
  0x46   : > { %p2356_p1 = scmp.ne.s32.totalorder %s3459_s7, %s2355_s29  ;;  %p2362_p10 = scmp.lt.u32.totalorder %s2355_s29, %s3459_s7 }
  0x48   : > { %p2358_p2 = pnand %p2356_p1, %p2877_p13 }
  0x4a   : > { %p2359_p6 = pneg %p2358_p2 }
  0x4c   : > { %p2364_p3 = pnand %p2362_p10, %p2359_p6 }
  0x4e   : > { %2367 = shalt.err (!%p2364_p3)
}
  0x4f   : > { %s2368_s25 = scalar_lea.vmem %s2867_s28, 16  ;;  %s2375_s10 = scalar_lea.vmem %s2867_s28, 32 }
  0x50   : > { %p2369_p5 = scmp.ne.s32.totalorder %s2867_s28, %s2368_s25  ;;  %p2376_p12 = scmp.lt.s32.totalorder %s2867_s28, %s2867_s28 }
  0x51   : > { %p2377_p0 = scmp.lt.s32.totalorder %s2375_s10, %s2368_s25 }
  0x52   : > { %p2371_p7 = pnand %p2369_p5, %p2877_p13 }
  0x53   : > { %p2378_p1 = por %p2377_p0, %p2376_p12 }
  0x54   : > { %p2372_p9 = pneg %p2371_p7 }
  0x56   : > { %p2379_p2 = pnand %p2378_p1, %p2372_p9 }
  0x58   : > { %2382 = shalt.err (!%p2379_p2)
}
  0x59   : > { %2173 = dma.hbm_to_vmem [thread:$0]  (!%p2863_p11), %s3459_s7, 16, %s2867_s28, [#allocation15]  }
  0x5a   : > { %s49_s21 = sadd.s32 1, %s2721_s17  ;;  %s66_s11 = sadd.s32 1, %s2713_s15 }
  0x5b   : > { %p51_p6 = scmp.ge.s32.totalorder %s49_s21, 2  ;;  %p73_p10 = scmp.ne.s32.totalorder %s2713_s15, %s2709_s14 }
  0x5c   : > { %p74_p3 = scmp.eq.s32.totalorder %s2725_s18, 0  ;;  %p2207_p5 = scmp.lt.s32.totalorder %s2725_s18, 2 }
  0x5d   : > { %s3505_s21 = smov (%p51_p6, %s49_s21), 0  ;;  %p3461_p9 = scmp.eq.s32.totalorder %s2833_s19, 1 }
  0x5e   : > { %3460 = sst [smem:[#allocation38_spill]] %s3505_s21  ;;  %p75_p7 = por %p74_p3, %p73_p10 }
  0x5f   : > { %p2935_p12 = por %p3461_p9, %p73_p10  ;;  %s61_s20 = ssub.s32 %s2721_s17, %s3505_s21 }
  0x60   : > { %s2942_s27 = sand.u32 1, %s2713_s15   ;;  %p64_p0 = scmp.eq.s32.totalorder %s61_s20, 0 }
  0x61   : > { %s3462_s12 = scalar_select %p2935_p12, 1, 0 }
  0x62   : > { %s2945_s28 = sshll.u32 %s2721_s17, 7  ;;  %p2947_p1 = pnand %p2207_p5, %p75_p7 }
  0x63   : > { %3463 = sst [smem:[#allocation39_spill]] %s3462_s12  ;;  %s2952_s25 = sand.u32 1, %s2725_s18  }
  0x64   : > { %s3464_s29 = scalar_select %p2947_p1, 1, 0 }
  0x65   : > { %s2955_s10 = scalar_select %p64_p0, %s2713_s15, %s66_s11  }
  0x66   : > { %s2958_s13 = sshll.u32 %s2942_s27, 3  ;;  %s3466_s1 = sld [smem:[#allocation41_spill]] }
  0x67   : > { %3465 = sst [smem:[#allocation40_spill]] %s2955_s10  ;;  %s455_s22 = scalar_lea.vmem [#allocation5], %s2958_s13 }
  0x68   : > { %s464_s6 = sshll.u32 %s455_s22, 4  ;;  %s2970_s7 = sshll.u32 %s2721_s17, 8  ;;  %s2967_s6 = int_to_ptr.vmem [resolvable:$true] %s464_s6 }
  0x69   : > { %p2977_p6 = pneg %p2947_p1 }
  0x6c   : > { %s2964_s20 = scalar_lea.hbm %s3466_s1, %s2945_s28  ;;  %s2388_s22 = scalar_lea.hbm %s3466_s1, 256 }
  0x6d   : > { %s2383_s21 = scalar_lea.hbm %s2964_s20, 128  ;;  %p2389_p5 = scmp.lt.u32.totalorder %s2964_s20, %s3466_s1 }
  0x6e   : > { %p2384_p2 = scmp.ne.s32.totalorder %s2964_s20, %s2383_s21  ;;  %p2390_p7 = scmp.lt.u32.totalorder %s2388_s22, %s2383_s21 }
  0x6f   : > { %p2392_p0 = scmp.lt.u32.totalorder %s2383_s21, %s2964_s20 }
  0x70   : > { %p2386_p10 = pnand %p2977_p6, %p2384_p2  ;;  %p2391_p9 = por %p2390_p7, %p2389_p5 }
  0x72   : > { %p2387_p3 = pneg %p2386_p10  ;;  %p2393_p12 = por %p2392_p0, %p2391_p9 }
  0x74   : > { %p2394_p4 = pnand %p2393_p12, %p2387_p3 }
  0x76   : > { %2397 = shalt.err (!%p2394_p4)
}
  0x77   : > { %s2398_s11 = scalar_lea.vmem %s2967_s6, 128  ;;  %s2731_s30 = smov [#allocation5]  }
  0x78   : > { %p2399_p2 = scmp.ne.s32.totalorder %s2967_s6, %s2398_s11  ;;  %s2403_s16 = sshll.u32 %s2731_s30, 4  ;;  %s2404_s16 = int_to_ptr.vmem [resolvable:$false] %s2403_s16 }
  0x79   : > { %s2405_s15 = scalar_lea.vmem %s2404_s16, 256  ;;  %p2406_p11 = scmp.lt.s32.totalorder %s2967_s6, %s2404_s16 }
  0x7a   : > { %p2401_p10 = pnand %p2399_p2, %p2977_p6  ;;  %p2407_p13 = scmp.lt.s32.totalorder %s2405_s15, %s2398_s11 }
  0x7c   : > { %p2402_p8 = pneg %p2401_p10  ;;  %p2408_p5 = por %p2407_p13, %p2406_p11 }
  0x7e   : > { %p2409_p7 = pnand %p2408_p5, %p2402_p8 }
  0x80   : > { %2412 = shalt.err (!%p2409_p7)
}
  0x81   : > { %s3468_s18 = smov 4   ;;  %s3469_s21 = smov 64  }
  0x82   : > { %s3470_s22 = scalar_lea.sflag [#allocation6], %s2952_s25  ;;  %s3471_s3 = sld [smem:[#allocation42_spill]] }
  0x83   : > { %2186 = dma.hbm_to_vmem [thread:$0]  (!%p2947_p1), %s2964_s20, 128, %s2967_s6, %s3470_s22, %s3469_s21, %s3469_s21, %s3468_s18  }
  0x84   : > { %s502_s15 = scalar_lea.vmem [#allocation8], %s2958_s13  ;;  %s3018_s19 = scalar_lea.hbm %s3400_s4, %s2970_s7 }
  0x85   : > { %s515_s1 = sshll.u32 %s502_s15, 4  ;;  %s499_s14 = scalar_lea.sflag [#allocation9], %s2952_s25  ;;  %s3012_s1 = int_to_ptr.vmem [resolvable:$true] %s515_s1 }
  0x88   : > { %s3009_s16 = scalar_lea.hbm %s3471_s3, %s2970_s7  ;;  %s2418_s30 = scalar_lea.hbm %s3471_s3, 512 }
  0x89   : > { %s2413_s6 = scalar_lea.hbm %s3009_s16, 128  ;;  %p2419_p13 = scmp.lt.u32.totalorder %s3009_s16, %s3471_s3 }
  0x8a   : > { %p2414_p4 = scmp.ne.s32.totalorder %s3009_s16, %s2413_s6  ;;  %p2420_p12 = scmp.lt.u32.totalorder %s2418_s30, %s2413_s6 }
  0x8b   : > { %p2422_p9 = scmp.lt.u32.totalorder %s2413_s6, %s3009_s16 }
  0x8c   : > { %p2416_p8 = pnand %p2414_p4, %p2977_p6  ;;  %p2421_p3 = por %p2420_p12, %p2419_p13 }
  0x8e   : > { %p2417_p11 = pneg %p2416_p8  ;;  %p2423_p0 = por %p2422_p9, %p2421_p3 }
  0x90   : > { %p2424_p2 = pnand %p2423_p0, %p2417_p11 }
  0x92   : > { %2427 = shalt.err (!%p2424_p2)
}
  0x93   : > { %s2428_s17 = scalar_lea.vmem %s3012_s1, 128  ;;  %s2732_s12 = smov [#allocation8]  }
  0x94   : > { %p2429_p10 = scmp.ne.s32.totalorder %s3012_s1, %s2428_s17  ;;  %s2433_s15 = sshll.u32 %s2732_s12, 4  ;;  %s2434_s15 = int_to_ptr.vmem [resolvable:$false] %s2433_s15 }
  0x95   : > { %s2435_s23 = scalar_lea.vmem %s2434_s15, 256  ;;  %p2436_p4 = scmp.lt.s32.totalorder %s3012_s1, %s2434_s15 }
  0x96   : > { %p2431_p5 = pnand %p2429_p10, %p2977_p6  ;;  %p2437_p8 = scmp.lt.s32.totalorder %s2435_s23, %s2428_s17 }
  0x98   : > { %p2432_p7 = pneg %p2431_p5  ;;  %p2438_p13 = por %p2437_p8, %p2436_p4 }
  0x9a   : > { %p2439_p12 = pnand %p2438_p13, %p2432_p7 }
  0x9c   : > { %2442 = shalt.err (!%p2439_p12)
}
  0x9d   : > { %2192 = dma.hbm_to_vmem [thread:$0]  (!%p2947_p1), %s3009_s16, 128, %s3012_s1, %s499_s14  }
  0x9e   : > { %s2733_s6 = smov [#allocation16]   ;;  %s2734_s22 = smov [#allocation17]  }
  0x9f   : > { %s402_s20 = sshll.u32 %s2733_s6, 4  ;;  %s416_s30 = sshll.u32 %s2734_s22, 4  ;;  %s403_s20 = int_to_ptr.vmem [resolvable:$true] %s402_s20  ;;  %s3044_s30 = int_to_ptr.vmem [resolvable:$true] %s416_s30 }
  0xa0   : > { %s2443_s12 = scalar_lea.hbm %s3404_s8, 3072  ;;  %p3472_p3 = scmp.ne.s32.totalorder %s3458_s24, 0 }
  0xa1   : > { %p2444_p11 = scmp.ne.s32.totalorder %s3404_s8, %s2443_s12  ;;  %p2450_p2 = scmp.lt.u32.totalorder %s2443_s12, %s3404_s8 }
  0xa3   : > { %p2446_p9 = pnand %p2444_p11, %p3472_p3 }
  0xa5   : > { %p2447_p0 = pneg %p2446_p9 }
  0xa7   : > { %p2452_p10 = pnand %p2450_p2, %p2447_p0 }
  0xa9   : > { %2455 = shalt.err (!%p2452_p10)
}
  0xaa   : > { %s2456_s16 = scalar_lea.vmem %s403_s20, 3072  ;;  %p2464_p8 = scmp.lt.s32.totalorder %s403_s20, %s403_s20 }
  0xab   : > { %p2457_p5 = scmp.ne.s32.totalorder %s403_s20, %s2456_s16  ;;  %p2465_p13 = scmp.lt.s32.totalorder %s2456_s16, %s2456_s16 }
  0xad   : > { %p2459_p7 = pnand %p2457_p5, %p3472_p3  ;;  %p2466_p12 = por %p2465_p13, %p2464_p8 }
  0xaf   : > { %p2460_p4 = pneg %p2459_p7 }
  0xb1   : > { %p2467_p1 = pnand %p2466_p12, %p2460_p4 }
  0xb3   : > { %2470 = shalt.err (!%p2467_p1)
}
  0xb4   : > { %p3473_p11 = scmp.ne.s32.totalorder %s3456_s26, 0  ;;  %s2471_s17 = scalar_lea.hbm %s3405_s9, 16 }
  0xb5   : > { %p2472_p9 = scmp.ne.s32.totalorder %s3405_s9, %s2471_s17  ;;  %p2478_p2 = scmp.lt.u32.totalorder %s2471_s17, %s3405_s9 }
  0xb6   : > { %2176 = dma.hbm_to_vmem [thread:$0]  (!%p3473_p11), %s3404_s8, 3072, %s403_s20, [#allocation15], %s3469_s21, %s3469_s21, %s3468_s18  }
  0xb7   : > { %p2474_p1 = pnand %p2472_p9, %p3472_p3 }
  0xb9   : > { %p2475_p0 = pneg %p2474_p1 }
  0xbb   : > { %p2480_p10 = pnand %p2478_p2, %p2475_p0 }
  0xbd   : > { %2483 = shalt.err (!%p2480_p10)
}
  0xbe   : > { %s2484_s18 = scalar_lea.vmem %s3044_s30, 16  ;;  %s2491_s21 = scalar_lea.vmem %s3044_s30, 32 }
  0xbf   : > { %p2485_p5 = scmp.ne.s32.totalorder %s3044_s30, %s2484_s18  ;;  %p2492_p8 = scmp.lt.s32.totalorder %s3044_s30, %s3044_s30 }
  0xc0   : > { %p2493_p13 = scmp.lt.s32.totalorder %s2491_s21, %s2484_s18 }
  0xc1   : > { %p2487_p7 = pnand %p2485_p5, %p3472_p3 }
  0xc2   : > { %p2494_p12 = por %p2493_p13, %p2492_p8 }
  0xc3   : > { %p2488_p4 = pneg %p2487_p7 }
  0xc5   : > { %p2495_p9 = pnand %p2494_p12, %p2488_p4 }
  0xc7   : > { %2498 = shalt.err (!%p2495_p9)
}
  0xc8   : > { %2179 = dma.hbm_to_vmem [thread:$0]  (!%p3473_p11), %s3405_s9, 16, %s3044_s30, [#allocation18]  }
  0xc9   : > { %s1844_s24 = sshll.u32 %s2942_s27, 2  ;;  %s3096_s22 = scalar_lea.hbm %s3396_s0, %s2945_s28 }
  0xca   : > { %s431_s26 = scalar_lea.vmem [#allocation2], %s1844_s24  ;;  %s1937_s17 = sadd.s32 64, %s2945_s28 }
  0xcb   : > { %s444_s11 = sshll.u32 %s431_s26, 4  ;;  %s428_s12 = scalar_lea.sflag [#allocation3], %s2942_s27  ;;  %s3100_s11 = int_to_ptr.vmem [resolvable:$true] %s444_s11 }
  0xcc   : > { %s2499_s15 = scalar_lea.hbm %s3096_s22, 64  ;;  %s2504_s1 = scalar_lea.hbm %s3396_s0, 256 }
  0xcd   : > { %p2500_p3 = scmp.ne.s32.totalorder %s3096_s22, %s2499_s15  ;;  %p2505_p0 = scmp.lt.u32.totalorder %s3096_s22, %s3396_s0 }
  0xce   : > { %p2506_p2 = scmp.lt.u32.totalorder %s2504_s1, %s2499_s15  ;;  %p2508_p5 = scmp.lt.u32.totalorder %s2499_s15, %s3096_s22 }
  0xcf   : > { %p2502_p11 = pnand %p2500_p3, %p2977_p6 }
  0xd0   : > { %p2507_p10 = por %p2506_p2, %p2505_p0 }
  0xd1   : > { %p2503_p1 = pneg %p2502_p11 }
  0xd2   : > { %p2509_p7 = por %p2508_p5, %p2507_p10 }
  0xd4   : > { %p2510_p4 = pnand %p2509_p7, %p2503_p1 }
  0xd6   : > { %2513 = shalt.err (!%p2510_p4)
}
  0xd7   : > { %s2514_s20 = scalar_lea.vmem %s3100_s11, 64  ;;  %s2735_s16 = smov [#allocation2]  }
  0xd8   : > { %p2515_p8 = scmp.ne.s32.totalorder %s3100_s11, %s2514_s20  ;;  %s2519_s3 = sshll.u32 %s2735_s16, 4  ;;  %s2520_s3 = int_to_ptr.vmem [resolvable:$false] %s2519_s3 }
  0xd9   : > { %s2521_s6 = scalar_lea.vmem %s2520_s3, 128  ;;  %p2522_p9 = scmp.lt.s32.totalorder %s3100_s11, %s2520_s3 }
  0xda   : > { %p2517_p13 = pnand %p2515_p8, %p2977_p6  ;;  %p2523_p3 = scmp.lt.s32.totalorder %s2521_s6, %s2514_s20 }
  0xdc   : > { %p2518_p12 = pneg %p2517_p13  ;;  %p2524_p11 = por %p2523_p3, %p2522_p9 }
  0xde   : > { %p2525_p0 = pnand %p2524_p11, %p2518_p12 }
  0xe0   : > { %2528 = shalt.err (!%p2525_p0)
}
  0xe1   : > { %p3474_p1 = scmp.ne.s32.totalorder %s3464_s29, 0  ;;  %s3130_s30 = scalar_lea.hbm %s3398_s2, %s1937_s17 }
  0xe2   : > { %s478_s23 = scalar_lea.vmem [#allocation7], %s1844_s24  ;;  %s1856_s18 = sshll.u32 %s2942_s27, 4 }
  0xe3   : > { %2183 = dma.hbm_to_vmem [thread:$0]  (!%p3474_p1), %s3096_s22, 64, %s3100_s11, %s428_s12  }
  0xe4   : > { %s491_s1 = sshll.u32 %s478_s23, 4  ;;  %s2529_s21 = scalar_lea.hbm %s3130_s30, 64  ;;  %s492_s1 = int_to_ptr.vmem [resolvable:$true] %s491_s1 }
  0xe5   : > { %p2530_p2 = scmp.ne.s32.totalorder %s3130_s30, %s2529_s21  ;;  %s2534_s11 = scalar_lea.hbm %s3398_s2, 256 }
  0xe6   : > { %p2535_p7 = scmp.lt.u32.totalorder %s3130_s30, %s3398_s2  ;;  %p2536_p4 = scmp.lt.u32.totalorder %s2534_s11, %s2529_s21 }
  0xe7   : > { %p2532_p10 = pnand %p2530_p2, %p2977_p6  ;;  %p2538_p13 = scmp.lt.u32.totalorder %s2529_s21, %s3130_s30 }
  0xe8   : > { %p2537_p8 = por %p2536_p4, %p2535_p7 }
  0xe9   : > { %p2533_p5 = pneg %p2532_p10 }
  0xea   : > { %p2539_p12 = por %p2538_p13, %p2537_p8 }
  0xec   : > { %p2540_p9 = pnand %p2539_p12, %p2533_p5 }
  0xee   : > { %2543 = shalt.err (!%p2540_p9)
}
  0xef   : > { %s2544_s27 = scalar_lea.vmem %s492_s1, 64  ;;  %s2736_s24 = smov [#allocation7]  }
  0xf0   : > { %p2545_p3 = scmp.ne.s32.totalorder %s492_s1, %s2544_s27  ;;  %s2549_s20 = sshll.u32 %s2736_s24, 4  ;;  %s2550_s20 = int_to_ptr.vmem [resolvable:$false] %s2549_s20 }
  0xf1   : > { %s2551_s16 = scalar_lea.vmem %s2550_s20, 128  ;;  %p2552_p2 = scmp.lt.s32.totalorder %s492_s1, %s2550_s20 }
  0xf2   : > { %p2547_p11 = pnand %p2545_p3, %p2977_p6  ;;  %p2553_p10 = scmp.lt.s32.totalorder %s2551_s16, %s2544_s27 }
  0xf4   : > { %p2548_p0 = pneg %p2547_p11  ;;  %p2554_p1 = por %p2553_p10, %p2552_p2 }
  0xf6   : > { %p2555_p4 = pnand %p2554_p1, %p2548_p0 }
  0xf8   : > { %2558 = shalt.err (!%p2555_p4)
}
  0xf9   : > { %p3475_p7 = scmp.ne.s32.totalorder %s3464_s29, 0  ;;  %s3476_s3 = scalar_lea.sflag [#allocation6], %s2952_s25 }
  0xfa   : > { %s526_s6 = scalar_lea.vmem [#allocation10], %s1856_s18  ;;  %s2559_s15 = scalar_lea.hbm %s3018_s19, 256 }
  0xfb   : > { %2189 = dma.hbm_to_vmem [thread:$0]  (!%p3475_p7), %s3130_s30, 64, %s492_s1, %s3476_s3  }
  0xfc   : > { %s535_s26 = sshll.u32 %s526_s6, 4  ;;  %p2560_p5 = scmp.ne.s32.totalorder %s3018_s19, %s2559_s15  ;;  %s3154_s26 = int_to_ptr.vmem [resolvable:$true] %s535_s26 }
  0xfd   : > { %s2564_s28 = scalar_lea.hbm %s3400_s4, 512  ;;  %p2565_p13 = scmp.lt.u32.totalorder %s3018_s19, %s3400_s4 }
  0xfe   : > { %p2562_p1 = pnand %p2560_p5, %p2977_p6  ;;  %p2566_p12 = scmp.lt.u32.totalorder %s2564_s28, %s2559_s15 }
  0xff   : > { %p2568_p3 = scmp.lt.u32.totalorder %s2559_s15, %s3018_s19 }
 0x100   : > { %p2563_p8 = pneg %p2562_p1  ;;  %p2567_p9 = por %p2566_p12, %p2565_p13 }
 0x102   : > { %p2569_p11 = por %p2568_p3, %p2567_p9 }
 0x104   : > { %p2570_p0 = pnand %p2569_p11, %p2563_p8 }
 0x106   : > { %2573 = shalt.err (!%p2570_p0)
}
 0x107   : > { %s2574_s30 = scalar_lea.vmem %s3154_s26, 256  ;;  %s2737_s1 = smov [#allocation10]  }
 0x108   : > { %p2575_p2 = scmp.ne.s32.totalorder %s3154_s26, %s2574_s30  ;;  %s2579_s18 = sshll.u32 %s2737_s1, 4  ;;  %s2580_s18 = int_to_ptr.vmem [resolvable:$false] %s2579_s18 }
 0x109   : > { %s2581_s17 = scalar_lea.vmem %s2580_s18, 512  ;;  %p2582_p5 = scmp.lt.s32.totalorder %s3154_s26, %s2580_s18 }
 0x10a   : > { %p2577_p10 = pnand %p2575_p2, %p2977_p6  ;;  %p2583_p1 = scmp.lt.s32.totalorder %s2581_s17, %s2574_s30 }
 0x10c   : > { %p2578_p4 = pneg %p2577_p10  ;;  %p2584_p13 = por %p2583_p1, %p2582_p5 }
 0x10e   : > { %p2585_p12 = pnand %p2584_p13, %p2578_p4 }
 0x110   : > { %2588 = shalt.err (!%p2585_p12)
}
 0x111   : > { %s2738_s12 = smov 128   ;;  %s2739_s27 = smov 8  }
 0x112   : > { %2195 = dma.hbm_to_vmem [thread:$0]  (!%p3475_p7), %s3018_s19, 256, %s3154_s26, %s499_s14, %s2738_s12, %s2738_s12, %s2739_s27  }
 0x113   : > { %s1941_s24 = sadd.s32 128, %s2970_s7  ;;  %s549_s6 = scalar_lea.vmem [#allocation11], %s2958_s13 }
 0x114   : > { %s3183_s3 = scalar_lea.hbm %s3401_s5, %s1941_s24  ;;  %s562_s15 = sshll.u32 %s549_s6, 4  ;;  %s563_s15 = int_to_ptr.vmem [resolvable:$true] %s562_s15 }
 0x115   : > { %s546_s23 = scalar_lea.sflag [#allocation12], %s2952_s25  ;;  %s2589_s21 = scalar_lea.hbm %s3183_s3, 128 }
 0x116   : > { %p2590_p8 = scmp.ne.s32.totalorder %s3183_s3, %s2589_s21  ;;  %s2594_s19 = scalar_lea.hbm %s3401_s5, 512 }
 0x117   : > { %p2595_p11 = scmp.lt.u32.totalorder %s3183_s3, %s3401_s5  ;;  %p2596_p0 = scmp.lt.u32.totalorder %s2594_s19, %s2589_s21 }
 0x118   : > { %p2592_p9 = pnand %p2590_p8, %p2977_p6  ;;  %p2598_p10 = scmp.lt.u32.totalorder %s2589_s21, %s3183_s3 }
 0x119   : > { %p2597_p2 = por %p2596_p0, %p2595_p11 }
 0x11a   : > { %p2593_p3 = pneg %p2592_p9 }
 0x11b   : > { %p2599_p4 = por %p2598_p10, %p2597_p2 }
 0x11d   : > { %p2600_p5 = pnand %p2599_p4, %p2593_p3 }
 0x11f   : > { %2603 = shalt.err (!%p2600_p5)
}
 0x120   : > { %s2604_s25 = scalar_lea.vmem %s563_s15, 128  ;;  %s2740_s13 = smov [#allocation11]  }
 0x121   : > { %p2605_p1 = scmp.ne.s32.totalorder %s563_s15, %s2604_s25  ;;  %s2609_s22 = sshll.u32 %s2740_s13, 4  ;;  %s2610_s22 = int_to_ptr.vmem [resolvable:$false] %s2609_s22 }
 0x122   : > { %s2611_s11 = scalar_lea.vmem %s2610_s22, 256  ;;  %p2612_p8 = scmp.lt.s32.totalorder %s563_s15, %s2610_s22 }
 0x123   : > { %p2607_p13 = pnand %p2605_p1, %p2977_p6  ;;  %p2613_p9 = scmp.lt.s32.totalorder %s2611_s11, %s2604_s25 }
 0x125   : > { %p2608_p12 = pneg %p2607_p13  ;;  %p2614_p7 = por %p2613_p9, %p2612_p8 }
 0x127   : > { %p2615_p0 = pnand %p2614_p7, %p2608_p12 }
 0x129   : > { %2618 = shalt.err (!%p2615_p0)
}
 0x12a   : > { %p3477_p11 = scmp.ne.s32.totalorder %s3464_s29, 0  ;;  %s3478_s30 = sld [smem:[#allocation37_spill]] }
 0x12c   : > { %2198 = dma.hbm_to_vmem [thread:$0]  (!%p3477_p11), %s3183_s3, 128, %s563_s15, %s546_s23  }
 0x130   : > { %p3479_p3 = scmp.ne.s32.totalorder %s3478_s30, 0 }
 0x131   : > { %s3480_s1 = sld [smem:[#allocation29_spill]] (!%p3479_p3)  ;;  %s3481_s10 = sld [smem:[#allocation35_spill]] (!%p3479_p3) }
 0x132   : > { %571 = sbr.rel (%p3479_p3) target bundleno = 1069 (0x42d), region = 60 }
 0x137   : > { %s3207_s18 = sand.u32 (!%p3479_p3), 1, %s3480_s1   ;;  %p3482_p6 = scmp.ne.s32.totalorder (!%p3479_p3), %s3481_s10, 0 }
 0x138   : > { %s1863_s17 = sshll.u32 (!%p3479_p3), %s3207_s18, 2  ;;  %s574_s12 = scalar_lea.sflag (!%p3479_p3), [#allocation3], %s3207_s18 }
 0x139   : > { %s3211_s27 = scalar_lea.vmem [#allocation2], %s1863_s17 }
 0x13a   : > { %2672 = dma.done.wait (%p3482_p6), %s574_s12, 64  }
 0x13b   : > { %2674 = vsyncadd (%p3482_p6), %s574_s12, 4294967232  ;;  %s3483_s29 = sld [smem:[#allocation34_spill]]  ;;  %s3219_s20 = sshll.u32 %s3207_s18, 3 }
 0x13c   : > { %s586_s3 = scalar_lea.vmem [#allocation5], %s3219_s20 }
 0x141   : > { %s582_s24 = sand.u32 1, %s3483_s29  }
 0x142   : > { %s583_s16 = scalar_lea.sflag [#allocation6], %s582_s24 }
 0x143   : > { %2676 = dma.done.wait (%p3482_p6), %s583_s16, 192  }
 0x144   : > { %2678 = vsyncadd (%p3482_p6), %s583_s16, 4294967104  ;;  %s3226_s6 = scalar_lea.vmem [#allocation7], %s1863_s17  ;;  %s601_s15 = scalar_lea.sflag [#allocation9], %s582_s24 }
 0x145   : > { %s604_s23 = scalar_lea.vmem [#allocation8], %s3219_s20 }
 0x146   : > { %2680 = dma.done.wait (%p3482_p6), %s601_s15, 384  }
 0x147   : > { %2682 = vsyncadd (%p3482_p6), %s601_s15, 4294966912  ;;  %s1867_s21 = sshll.u32 %s3207_s18, 4  ;;  %s619_s7 = scalar_lea.sflag [#allocation12], %s582_s24 }
 0x148   : > { %s613_s14 = scalar_lea.vmem [#allocation10], %s1867_s21  ;;  %s622_s19 = scalar_lea.vmem [#allocation11], %s3219_s20 }
 0x149   : > { %2684 = dma.done.wait (%p3482_p6), %s619_s7, 128  }
 0x14a   : > { %2686 = vsyncadd (%p3482_p6), %s619_s7, 4294967168  ;;  %p3484_p7 = scmp.eq.s32.totalorder %s3483_s29, 0 }
 0x14c   : > { %2688 = dma.done.wait (%p3484_p7), [#allocation12], 3072   ;;  %p3485_p2 = pmov %p3484_p7 }
 0x14e   : > { %2690 = vsyncadd (%p3485_p2), [#allocation12], 4294964224  ;;  %p3486_p10 = pmov %p3485_p2 }
 0x14f   : > { %p3487_p4 = pmov %p3485_p2 }
 0x150   : > { %2692 = dma.done.wait (%p3486_p10), [#allocation15], 3088  }
 0x151   : > { %2694 = vsyncadd (%p3487_p4), [#allocation15], 4294964208  ;;  %p3488_p5 = pmov %p3485_p2 }
 0x152   : > { %p3489_p1 = pmov %p3485_p2 }
 0x153   : > { %2696 = dma.done.wait (%p3488_p5), [#allocation18], 16  }
 0x154   : > { %2698 = vsyncadd (%p3489_p1), [#allocation18], 4294967280  ;;  %v2741_v0 = vmov 0   ;;  %v749_v1 = vld [vmem:[%s613_s14 + $0x8] sm:$0xff]  ;;  %v750_v3 = vld [vmem:[%s622_s19] sm:$0xff]  ;;  %v2742_v17 = vmov 0.0   ;;  %v752_v29 = vlaneseq }
 0x155   : > { %2275 = vset.pattern.permute.xlu1 %v2741_v0  ;;  %2274 = vset.pattern.permute.xlu0 %v2741_v0  ;;  %v747_v2 = vld [vmem:[%s604_s23] sm:$0xff]  ;;  %v785_v5 = vmul.f32 0.0, %v750_v3  ;;  %v748_v8 = vld [vmem:[%s613_s14] sm:$0xff]  ;;  %v2279_v10 = vld [vmem:[#allocation13 + $0x58] sm:$0xff]   ;;  %vm734_vm0 = vcmask 1043456   ;;  %vm2743_vm3 = vmmov 0  }
 0x156   : > { %798 = vperm.xlu1 %2275, %v749_v1   ;;  %v782_v4 = vmul.f32 0.0, %v747_v2  ;;  %v2276_v6 = vld [vmem:[#allocation13 + $0x40] sm:$0xff]   ;;  %v2277_v7 = vld [vmem:[#allocation13 + $0x48] sm:$0xff]   ;;  %v2278_v9 = vld [vmem:[#allocation13 + $0x50] sm:$0xff]   ;;  %2069 = vmatprep.subr.bf16.mxu1 %v2742_v17  ;;  %v3269_v36 = vshrl.u32 %v752_v29, 7  ;;  %s3490_s26 = sld [smem:[#allocation31_spill]] }
 0x157   : > { %2009 = vmatprep.subr.bf16.mxu0 %v2276_v6  ;;  %v2280_v11 = vld [vmem:[#allocation13 + $0x60] sm:$0xff]   ;;  %v2281_v12 = vld [vmem:[#allocation13 + $0x68] sm:$0xff]   ;;  %v2285_v13 = vld [vmem:[#allocation13 + $0x70] sm:$0xff]   ;;  %2085 = vmatprep.mubr.msk.bf16.mxu1 %vm2743_vm3, %v2742_v17  ;;  %vm1323_vm4 = vsmask.f32 4352  ;;  %s3491_s28 = sld [smem:[#allocation39_spill]] }
 0x158   : > { %788 = vperm.xlu0 %2274, %v782_v4   ;;  %2010 = vmatpush3.bf16.msra.mxu0 %v2276_v6  ;;  %v2286_v14 = vld [vmem:[#allocation13 + $0x78] sm:$0xff]   ;;  %v2287_v15 = vld [vmem:[#allocation13] sm:$0xff]   ;;  %v2304_v18 = vld [vmem:[#allocation16 + $0x48] sm:$0xff]   ;;  %vm814_vm1 = vcmp.lt.s32.totalorder %v3269_v36, 1  ;;  %vm1054_vm2 = vcmp.lt.s32.totalorder %v3269_v36, 7  ;;  %s699_s13 = scalar_lea.vmem [#allocation19], %s3219_s20 }
 0x159   : > { %2011 = vmatprep.subr.bf16.mxu0 %v2277_v7  ;;  %v2303_v16 = vld [vmem:[#allocation16 + $0x40] sm:$0xff]   ;;  %v2305_v19 = vld [vmem:[#allocation16 + $0x50] sm:$0xff]   ;;  %v2306_v20 = vld [vmem:[#allocation16 + $0x58] sm:$0xff]   ;;  %vm1449_vm5 = vsmask.f32 7424  ;;  %s1591_s22 = sshll.u32 %s699_s13, 4  ;;  %s3347_s22 = int_to_ptr.vmem [resolvable:$true] %s1591_s22 }
 0x15a   : > { %803 = vperm.xlu1 %2275, %v785_v5   ;;  %2070 = vmatpush3.bf16.msra.mxu1 %v2303_v16  ;;  %v2307_v21 = vld [vmem:[#allocation16 + $0x60] sm:$0xff]   ;;  %v2282_v22 = vld [vmem:[%s586_s3 + $0x4] ss:$0 sps:$4 sm:$0xff]   ;;  %v2283_v23 = vld [vmem:[%s3226_s6] ss:$0 sps:$4 sm:$0xff]   ;;  %s3492_s1 = sld [smem:[#allocation45_spill]] }
 0x15b   : > { %2071 = vmatprep.subr.bf16.mxu1 %v2742_v17  ;;  %v2284_v24 = vld [vmem:[%s586_s3] ss:$0 sps:$4 sm:$0xff]   ;;  %v721_v25 = vld [vmem:[%s3211_s27] sm:$0xf]  ;;  %v741_v26 = vsel %vm734_vm0, %v2282_v22, %v2283_v23  ;;  %v2290_v52 = vld [vmem:[#allocation13 + $0x18] sm:$0xff]   ;;  %s1576_s17 = scalar_lea.sflag [#allocation4], %s3207_s18 }
 0x15c   : > { %793 = vperm.xlu0 %2274, %v748_v8   ;;  %2012 = vmatpush3.bf16.msra.mxu0 %v2277_v7  ;;  %v737_v27 = vsel %vm734_vm0, %v721_v25, %v2284_v24  ;;  %v746_v31 = vunpack.c.h.bf16 %v741_v26  ;;  %v745_v32 = vunpack.c.l.bf16 %v741_v26  ;;  %v2288_v47 = vld [vmem:[#allocation13 + $0x8] sm:$0xff]   ;;  %v2289_v51 = vld [vmem:[#allocation13 + $0x10] sm:$0xff]   ;;  %v2291_v53 = vld [vmem:[#allocation13 + $0x20] sm:$0xff]   ;;  %s1944_s25 = sshll.u32 %s3490_s26, 7  ;;  %s2619_s12 = scalar_lea.vmem %s3347_s22, 128 }
 0x15d   : > { %2013 = vmatprep.subr.bf16.mxu0 %v2278_v9  ;;  %v743_v30 = vunpack.c.l.bf16 %v737_v27  ;;  %v744_v34 = vunpack.c.h.bf16 %v737_v27  ;;  %v2292_v54 = vld [vmem:[#allocation13 + $0x28] sm:$0xff]   ;;  %v2293_v55 = vld [vmem:[#allocation13 + $0x30] sm:$0xff]   ;;  %v2294_v56 = vld [vmem:[#allocation13 + $0x38] sm:$0xff]   ;;  %p2620_p13 = scmp.ne.s32.totalorder %s3347_s22, %s2619_s12  ;;  %p3493_p12 = scmp.ne.s32.totalorder %s3491_s28, 0 }
 0x15e   : > { %2072 = vmatpush3.bf16.msra.mxu1 %v2304_v18  ;;  %v2295_v61 = vld [vmem:[#allocation13 + $0x80] sm:$0xff]   ;;  %v2296_v3 = vld [vmem:[#allocation13 + $0x88] sm:$0xff]   ;;  %v2297_v5 = vld [vmem:[#allocation13 + $0x90] sm:$0xff]   ;;  %s2744_s27 = smov [#allocation19]  }
 0x15f   : > { %2073 = vmatprep.subr.bf16.mxu1 %v2742_v17  ;;  %v2298_v6 = vld [vmem:[#allocation13 + $0x98] sm:$0xff]   ;;  %v2299_v7 = vld [vmem:[#allocation13 + $0xa0] sm:$0xff]   ;;  %v2300_v8 = vld [vmem:[#allocation13 + $0xa8] sm:$0xff]   ;;  %p2621_p8 = pnand %p2620_p13, %p3493_p12  ;;  %s2623_s29 = sshll.u32 %s2744_s27, 4  ;;  %s2624_s29 = int_to_ptr.vmem [resolvable:$false] %s2623_s29 }
 0x160   : > { %2014 = vmatpush3.bf16.msra.mxu0 %v2278_v9  ;;  %v2301_v9 = vld [vmem:[#allocation13 + $0xb0] sm:$0xff]   ;;  %v2310_v18 = vld [vmem:[#allocation16 + $0x78] sm:$0xff]   ;;  %s3345_s10 = scalar_lea.hbm %s3492_s1, %s1944_s25  ;;  %s2625_s24 = scalar_lea.vmem %s2624_s29, 256 }
 0x161   : > { %2015 = vmatprep.subr.bf16.mxu0 %v2279_v10  ;;  %v2309_v16 = vld [vmem:[#allocation16 + $0x70] sm:$0xff]   ;;  %p2622_p9 = pneg %p2621_p8  ;;  %p2626_p0 = scmp.lt.s32.totalorder %s3347_s22, %s2624_s29 }
 0x162   : > { %2074 = vmatpush3.bf16.msra.mxu1 %v2305_v19  ;;  %v1901_v19 = vld [vmem:[#allocation14] ss:$0 sm:$0xff]  ;;  %p2627_p11 = scmp.lt.s32.totalorder %s2625_s24, %s2619_s12 }
 0x163   : > { %2075 = vmatprep.subr.bf16.mxu1 %v2742_v17 }
 0x164   : > { %2016 = vmatpush3.bf16.msra.mxu0 %v2279_v10  ;;  %v2302_v10 = vld [vmem:[#allocation13 + $0xb8] sm:$0xff]   ;;  %p2628_p3 = por %p2627_p11, %p2626_p0 }
 0x165   : > { %2017 = vmatprep.subr.bf16.mxu0 %v2280_v11 }
 0x166   : > { %2076 = vmatpush3.bf16.msra.mxu1 %v2306_v20  ;;  %p2629_p6 = pnand %p2628_p3, %p2622_p9 }
 0x167   : > { %2077 = vmatprep.subr.bf16.mxu1 %v2742_v17 }
 0x168   : > { %2018 = vmatpush3.bf16.msra.mxu0 %v2280_v11 }
 0x169   : > { %2019 = vmatprep.subr.bf16.mxu0 %v2281_v12 }
 0x16a   : > { %2078 = vmatpush3.bf16.msra.mxu1 %v2307_v21 }
 0x16b   : > { %2079 = vmatprep.subr.bf16.mxu1 %v2742_v17 }
 0x16c   : > { %2020 = vmatpush3.bf16.msra.mxu0 %v2281_v12 }
 0x16d   : > { %2021 = vmatprep.subr.bf16.mxu0 %v2285_v13 }
 0x170   : > { %2022 = vmatpush3.bf16.msra.mxu0 %v2285_v13 }
 0x171   : > { %2023 = vmatprep.subr.bf16.mxu0 %v2286_v14 }
 0x174   : > { %2024 = vmatpush3.bf16.msra.mxu0 %v2286_v14 }
 0x175   : > { %2029 = vmatprep.subr.bf16.mxu0 %v2287_v15 }
 0x1d5   : > { %v3263_v28 = vpop.permute.xlu1 %798 }
 0x1d6   : > { %v3278_v39 = vmul.f32 %v3263_v28, %v745_v32 }
 0x1d7   : > { %v3265_v33 = vpop.permute.xlu0 %788 }
 0x1d8   : > { %v3272_v37 = vmul.f32 %v3265_v33, %v743_v30  ;;  %v812_v58 = vrot.slane %v3278_v39, 7  ;;  %v1052_v59 = vrot.slane %v3278_v39, 1 }
 0x1d9   : > { %v3267_v35 = vpop.permute.xlu1 %803 }
 0x1da   : > { %v3275_v38 = vmul.f32 %v3267_v35, %v746_v31  ;;  %v810_v43 = vrot.slane %v3272_v37, 7  ;;  %v1050_v60 = vrot.slane %v3272_v37, 1 }
 0x1db   : > { %v3280_v40 = vpop.permute.xlu0 %793 }
 0x1dc   : > { %v813_v41 = vrot.slane %v3275_v38, 7  ;;  %v807_v42 = vmul.f32 %v3280_v40, %v744_v34  ;;  %v838_v46 = vpack.c.bf16 %v3275_v38, %v3278_v39  ;;  %v1053_v11 = vrot.slane %v3275_v38, 1 }
 0x1de   : > { %v811_v44 = vrot.slane %v807_v42, 7  ;;  %v837_v45 = vpack.c.bf16 %v807_v42, %v3272_v37  ;;  %v818_v49 = vsel %vm814_vm1, %v813_v41, %v810_v43  ;;  %v1051_v57 = vrot.slane %v807_v42, 1 }
 0x1df   : > { %v815_v1 = vsel %vm814_vm1, %v812_v58, %v813_v41  ;;  %v1055_v12 = vsel %vm1054_vm2, %v1052_v59, %v1053_v11  ;;  %v1058_v13 = vsel %vm1054_vm2, %v1053_v11, %v1050_v60  ;;  %v2326_v11 = vld [vmem:[#allocation16 + $0xb8] sm:$0xff]  }
 0x1e0   : > { %2025 = vmatprep.mubr.bf16.mxu0 %v837_v45  ;;  %v817_v48 = vsel %vm814_vm1, %v810_v43, %v811_v44  ;;  %v816_v62 = vsel %vm814_vm1, %v811_v44, %v812_v58  ;;  %v1056_v63 = vsel %vm1054_vm2, %v1051_v57, %v1052_v59  ;;  %v1057_v0 = vsel %vm1054_vm2, %v1050_v60, %v1051_v57  ;;  %v2311_v44 = vld [vmem:[#allocation16] sm:$0xff]   ;;  %v2313_v60 = vld [vmem:[#allocation16 + $0x10] sm:$0xff]  }
 0x1e1   : > { %2026 = vmatmul.mubr.bf16.vlgmr.msra.gmra.mrb[0].mxu0 %v838_v46  ;;  %v819_v50 = vpack.c.bf16 %v817_v48, %v818_v49  ;;  %v820_v2 = vpack.c.bf16 %v815_v1, %v816_v62  ;;  %v1059_v4 = vpack.c.bf16 %v1056_v63, %v1057_v0  ;;  %v1060_v14 = vpack.c.bf16 %v1058_v13, %v1055_v12  ;;  %v2314_v63 = vld [vmem:[#allocation16 + $0x18] sm:$0xff]   ;;  %v2315_v0 = vld [vmem:[#allocation16 + $0x20] sm:$0xff]   ;;  %v2316_v1 = vld [vmem:[#allocation16 + $0x28] sm:$0xff]  }
 0x1e2   : > { %2030 = vmatpush3.bf16.msra.mxu0 %v2287_v15  ;;  %v2308_v15 = vld [vmem:[#allocation16 + $0x68] sm:$0xff]  }
 0x1e3   : > { %2045 = vmatprep.mubr.bf16.mxu0 %v819_v50  ;;  %2031 = vmatprep.subr.bf16.mxu0 %v2288_v47 }
 0x1e4   : > { %2080 = vmatpush3.bf16.msra.mxu1 %v2308_v15 }
 0x1e5   : > { %2081 = vmatprep.subr.bf16.mxu1 %v2742_v17 }
 0x1e6   : > { %2032 = vmatpush3.bf16.msra.mxu0 %v2288_v47 }
 0x1e7   : > { %2033 = vmatprep.subr.bf16.mxu0 %v2289_v51 }
 0x1e8   : > { %2082 = vmatpush3.bf16.msra.mxu1 %v2309_v16 }
 0x1e9   : > { %2083 = vmatprep.subr.bf16.mxu1 %v2742_v17 }
 0x1ea   : > { %2034 = vmatpush3.bf16.msra.mxu0 %v2289_v51 }
 0x1eb   : > { %2035 = vmatprep.subr.bf16.mxu0 %v2290_v52 }
 0x1ec   : > { %2084 = vmatpush3.bf16.msra.mxu1 %v2310_v18 }
 0x1ed   : > { %2089 = vmatprep.subr.bf16.mxu1 %v2742_v17 }
 0x1ee   : > { %2036 = vmatpush3.bf16.msra.mxu0 %v2290_v52 }
 0x1ef   : > { %2037 = vmatprep.subr.bf16.mxu0 %v2291_v53 }
 0x1f2   : > { %2038 = vmatpush3.bf16.msra.mxu0 %v2291_v53  ;;  %v2312_v53 = vld [vmem:[#allocation16 + $0x8] sm:$0xff]  }
 0x1f3   : > { %2039 = vmatprep.subr.bf16.mxu0 %v2292_v54 }
 0x1f6   : > { %2040 = vmatpush3.bf16.msra.mxu0 %v2292_v54 }
 0x1f7   : > { %2041 = vmatprep.subr.bf16.mxu0 %v2293_v55 }
 0x1fa   : > { %2042 = vmatpush3.bf16.msra.mxu0 %v2293_v55 }
 0x1fb   : > { %2043 = vmatprep.subr.bf16.mxu0 %v2294_v56 }
 0x1fe   : > { %2044 = vmatpush3.bf16.msra.mxu0 %v2294_v56 }
 0x1ff   : > { %2049 = vmatprep.subr.bf16.mxu0 %v2295_v61 }
 0x201   : > { %2046 = vmatmul.mubr.bf16.vlgmr.msra.gmra.mrb[0].mxu0 %v820_v2  ;;  %v2317_v2 = vld [vmem:[#allocation16 + $0x30] sm:$0xff]  }
 0x202   : > { %2050 = vmatpush3.bf16.msra.mxu0 %v2295_v61  ;;  %2065 = vmatprep.mubr.bf16.mxu0 %v1059_v4  ;;  %v2319_v4 = vld [vmem:[#allocation16 + $0x80] sm:$0xff]  }
 0x203   : > { %2051 = vmatprep.subr.bf16.mxu0 %v2296_v3 }
 0x206   : > { %2052 = vmatpush3.bf16.msra.mxu0 %v2296_v3  ;;  %v2318_v3 = vld [vmem:[#allocation16 + $0x38] sm:$0xff]  }
 0x207   : > { %2053 = vmatprep.subr.bf16.mxu0 %v2297_v5 }
 0x20a   : > { %2054 = vmatpush3.bf16.msra.mxu0 %v2297_v5  ;;  %v2320_v5 = vld [vmem:[#allocation16 + $0x88] sm:$0xff]  }
 0x20b   : > { %2055 = vmatprep.subr.bf16.mxu0 %v2298_v6 }
 0x20e   : > { %2056 = vmatpush3.bf16.msra.mxu0 %v2298_v6  ;;  %v2321_v6 = vld [vmem:[#allocation16 + $0x90] sm:$0xff]  }
 0x20f   : > { %2057 = vmatprep.subr.bf16.mxu0 %v2299_v7 }
 0x212   : > { %2058 = vmatpush3.bf16.msra.mxu0 %v2299_v7  ;;  %v2322_v7 = vld [vmem:[#allocation16 + $0x98] sm:$0xff]  }
 0x213   : > { %2059 = vmatprep.subr.bf16.mxu0 %v2300_v8 }
 0x216   : > { %2060 = vmatpush3.bf16.msra.mxu0 %v2300_v8  ;;  %v2323_v8 = vld [vmem:[#allocation16 + $0xa0] sm:$0xff]  }
 0x217   : > { %2061 = vmatprep.subr.bf16.mxu0 %v2301_v9 }
 0x21a   : > { %2062 = vmatpush3.bf16.msra.mxu0 %v2301_v9  ;;  %v2324_v9 = vld [vmem:[#allocation16 + $0xa8] sm:$0xff]  }
 0x21b   : > { %2063 = vmatprep.subr.bf16.mxu0 %v2302_v10 }
 0x21e   : > { %2064 = vmatpush3.bf16.msra.mxu0 %v2302_v10  ;;  %v2325_v10 = vld [vmem:[#allocation16 + $0xb0] sm:$0xff]  }
 0x221   : > { %2066 = vmatmul.mubr.bf16.vlgmr.msra.gmra.mrb[0].mxu0 %v1060_v14 }
 0x2f4   : > { %v2067_v20 = vpop.f32.mrb[0].mxu0 }
 0x2f5   : > { %v1188_v21 = vadd.f32 %v2067_v20, %v1901_v19  ;;  %v1160_v22 = vpop.f32.mrb[1].mxu0 }
 0x2f6   : > { %v1186_v23 = vadd.f32 %v1901_v19, %v1160_v22  ;;  %v2068_v24 = vpop.f32.mrb[2].mxu0 }
 0x2f7   : > { %v1192_v25 = vmax.f32 %v1188_v21, 0.0  ;;  %v1189_v26 = vadd.f32 %v2068_v24, %v1901_v19  ;;  %v1163_v27 = vpop.f32.mrb[3].mxu0  ;;  %v1926_v24 = vld [vmem:[#allocation17] ss:$0 sm:$0xff] }
 0x2f8   : > { %v1190_v29 = vmax.f32 %v1186_v23, 0.0  ;;  %v1187_v30 = vadd.f32 %v1901_v19, %v1163_v27 }
 0x2f9   : > { %v1196_v31 = vmul.f32 %v1192_v25, %v3263_v28  ;;  %v1193_v32 = vmax.f32 %v1189_v26, 0.0 }
 0x2fa   : > { %v1191_v34 = vmax.f32 %v1187_v30, 0.0  ;;  %v1194_v38 = vmul.f32 %v1190_v29, %v3265_v33 }
 0x2fb   : > { %v1199_v36 = vpack.c.bf16 %v1196_v31, %v1196_v31  ;;  %v1197_v37 = vmul.f32 %v1193_v32, %v3267_v35 }
 0x2fc   : > { %v1195_v39 = vmul.f32 %v1191_v34, %v3280_v40 }
 0x2fd   : > { %v1333_v41 = vshrl.u32 %v1199_v36, 16  ;;  %v1336_v42 = vshll.u32 %v1199_v36, 16  ;;  %v1431_v43 = vpack.c.bf16 %v1197_v37, %v1197_v37 }
 0x2fe   : > { %v1198_v45 = vpack.c.bf16 %v1195_v39, %v1194_v38  ;;  %v1216_v46 = vpack.c.bf16 %v1196_v31, %v1195_v39 }
 0x2ff   : > { %v1335_v47 = vrot.slane %v1333_v41, 3  ;;  %v1338_v48 = vrot.slane %v1336_v42, 4  ;;  %v1458_v49 = vshll.u32 %v1431_v43, 16 }
 0x300   : > { %v1325_v50 = vshrl.u32 %v1198_v45, 16  ;;  %v1328_v51 = vshll.u32 %v1198_v45, 16  ;;  %2086 = vmatmul.mubr.bf16.vlgmr.msra.gmra.mrb[0].mxu1 %v1216_v46  ;;  %v1453_v52 = vshll.u32 %v1216_v46, 16  ;;  %v1451_v54 = vshrl.u32 %v1216_v46, 16 }
 0x301   : > { %2090 = vmatpush3.bf16.msra.mxu1 %v2311_v44  ;;  %2105 = vmatprep.mubr.msk.bf16.mxu1 %vm2743_vm3, %v2742_v17  ;;  %v1460_v56 = vrot.slane %v1458_v49, 1  ;;  %v1339_v58 = vor.u32 %v1338_v48, %v1335_v47 }
 0x302   : > { %v1327_v33 = vrot.slane %v1325_v50, 3  ;;  %v1330_v35 = vrot.slane %v1328_v51, 4  ;;  %v1455_v55 = vrot.slane %v1453_v52, 1  ;;  %2091 = vmatprep.subr.bf16.mxu1 %v2742_v17 }
 0x304   : > { %v1331_v57 = vor.u32 %v1330_v35, %v1327_v33  ;;  %v1456_v59 = vor.u32 %v1455_v55, %v1451_v54 }
 0x305   : > { %2092 = vmatpush3.bf16.msra.mxu1 %v2312_v53 }
 0x306   : > { %2093 = vmatprep.subr.bf16.mxu1 %v2742_v17  ;;  %v1340_v61 = vsel %vm1323_vm4, %v1331_v57, %v1339_v58  ;;  %v1461_v62 = vsel %vm1449_vm5, %v1456_v59, %v1460_v56 }
 0x309   : > { %2094 = vmatpush3.bf16.msra.mxu1 %v2313_v60 }
 0x30a   : > { %2095 = vmatprep.subr.bf16.mxu1 %v2742_v17 }
 0x30d   : > { %2096 = vmatpush3.bf16.msra.mxu1 %v2314_v63 }
 0x30e   : > { %2097 = vmatprep.subr.bf16.mxu1 %v2742_v17 }
 0x311   : > { %2098 = vmatpush3.bf16.msra.mxu1 %v2315_v0 }
 0x312   : > { %2099 = vmatprep.subr.bf16.mxu1 %v2742_v17 }
 0x315   : > { %2100 = vmatpush3.bf16.msra.mxu1 %v2316_v1 }
 0x316   : > { %2101 = vmatprep.subr.bf16.mxu1 %v2742_v17 }
 0x319   : > { %2102 = vmatpush3.bf16.msra.mxu1 %v2317_v2 }
 0x31a   : > { %2103 = vmatprep.subr.bf16.mxu1 %v2742_v17 }
 0x31d   : > { %2104 = vmatpush3.bf16.msra.mxu1 %v2318_v3 }
 0x31e   : > { %2109 = vmatprep.subr.bf16.mxu1 %v2742_v17 }
 0x320   : > { %2106 = vmatmul.mubr.bf16.vlgmr.msra.gmra.mrb[4].mxu1 %v1340_v61 }
 0x321   : > { %2110 = vmatpush3.bf16.msra.mxu1 %v2319_v4  ;;  %2125 = vmatprep.mubr.msk.bf16.mxu1 %vm2743_vm3, %v2742_v17 }
 0x322   : > { %2111 = vmatprep.subr.bf16.mxu1 %v2742_v17 }
 0x325   : > { %2112 = vmatpush3.bf16.msra.mxu1 %v2320_v5 }
 0x326   : > { %2113 = vmatprep.subr.bf16.mxu1 %v2742_v17 }
 0x329   : > { %2114 = vmatpush3.bf16.msra.mxu1 %v2321_v6 }
 0x32a   : > { %2115 = vmatprep.subr.bf16.mxu1 %v2742_v17 }
 0x32d   : > { %2116 = vmatpush3.bf16.msra.mxu1 %v2322_v7 }
 0x32e   : > { %2117 = vmatprep.subr.bf16.mxu1 %v2742_v17 }
 0x331   : > { %2118 = vmatpush3.bf16.msra.mxu1 %v2323_v8 }
 0x332   : > { %2119 = vmatprep.subr.bf16.mxu1 %v2742_v17 }
 0x335   : > { %2120 = vmatpush3.bf16.msra.mxu1 %v2324_v9 }
 0x336   : > { %2121 = vmatprep.subr.bf16.mxu1 %v2742_v17 }
 0x339   : > { %2122 = vmatpush3.bf16.msra.mxu1 %v2325_v10 }
 0x33a   : > { %2123 = vmatprep.subr.bf16.mxu1 %v2742_v17 }
 0x33d   : > { %2124 = vmatpush3.bf16.msra.mxu1 %v2326_v11 }
 0x340   : > { %2126 = vmatmul.mubr.bf16.vlgmr.msra.gmra.mrb[8].mxu1 %v1461_v62 }
 0x3d3   : > { %v1316_v12 = vpop.f32.mrb[0].mxu1 }
 0x3d4   : > { %v2087_v13 = vpop.f32.mrb[1].mxu1 }
 0x3d5   : > { %v1319_v14 = vpop.f32.mrb[2].mxu1 }
 0x3d6   : > { %v2088_v15 = vpop.f32.mrb[3].mxu1 }
 0x3f3   : > { %v1424_v16 = vpop.f32.mrb[4].mxu1 }
 0x3f4   : > { %v1425_v18 = vadd.f32 %v1424_v16, %v1316_v12  ;;  %v2107_v19 = vpop.f32.mrb[5].mxu1 }
 0x3f5   : > { %v1427_v20 = vpop.f32.mrb[6].mxu1 }
 0x3f6   : > { %v1428_v21 = vadd.f32 %v1427_v20, %v1319_v14  ;;  %v2108_v22 = vpop.f32.mrb[7].mxu1 }
 0x413   : > { %v1545_v23 = vpop.f32.mrb[8].mxu1 }
 0x414   : > { %v1552_v25 = vadd.f32 %v1545_v23, %v1425_v18  ;;  %v2127_v26 = vpop.f32.mrb[9].mxu1 }
 0x415   : > { %v1548_v17 = vpop.f32.mrb[10].mxu1 }
 0x416   : > { %v1561_v27 = vadd.f32 %v1926_v24, %v1552_v25  ;;  %v1553_v29 = vadd.f32 %v1548_v17, %v1428_v21  ;;  %v2128_v30 = vpop.f32.mrb[11].mxu1 }
 0x418   : > { %v1562_v31 = vadd.f32 %v1926_v24, %v1553_v29  ;;  %v1563_v32 = vmul.f32 %v1561_v27, %v3280_v40 }
 0x41a   : > { %v1564_v34 = vmul.f32 %v1562_v31, %v3263_v28 }
 0x41c   : > { %v1948_v36 = vpack.c.bf16 %v1564_v34, %v1563_v32 }
 0x41e   : > { %1949 = vst [vmem:[%s699_s13] sm:$0xff] %v1948_v36  }
 0x41f   : > { %2632 = shalt.err (!%p2629_p6)
}
 0x420   : > { %s2633_s20 = scalar_lea.hbm %s3345_s10, 128  ;;  %s2637_s6 = scalar_lea.hbm %s3492_s1, 256 }
 0x421   : > { %p2634_p7 = scmp.ne.s32.totalorder %s3345_s10, %s2633_s20  ;;  %p2638_p4 = scmp.lt.u32.totalorder %s3345_s10, %s3492_s1 }
 0x422   : > { %p2639_p5 = scmp.lt.u32.totalorder %s2637_s6, %s2633_s20  ;;  %p2641_p13 = scmp.lt.u32.totalorder %s2633_s20, %s3345_s10 }
 0x423   : > { %p2635_p2 = pnand %p2634_p7, %p3493_p12 }
 0x424   : > { %p2640_p1 = por %p2639_p5, %p2638_p4 }
 0x425   : > { %p2636_p10 = pneg %p2635_p2 }
 0x426   : > { %p2642_p8 = por %p2641_p13, %p2640_p1 }
 0x428   : > { %p2643_p9 = pnand %p2642_p8, %p2636_p10 }
 0x42a   : > { %2646 = shalt.err (!%p2643_p9)
}
 0x42b   : > { %s2745_s21 = smov 64   ;;  %s2746_s14 = smov 4  }
 0x42c   : > { %2165 = dma.vmem_to_hbm [thread:$0]  (%p3493_p12), %s3347_s22, 128, %s3345_s10, %s1576_s17, %s2745_s21, %s2745_s21, %s2746_s14  }
 0x42d PF: > { %s3494_s7 = sld [smem:[#allocation28_spill]]  ;;  %s3495_s19 = sld [smem:[#allocation36_spill]] }
 0x42e   : > { %s3496_s26 = sld [smem:[#allocation33_spill]] }
 0x433   : > { %s1606_s25 = sand.u32 1, %s3494_s7   ;;  %p3497_p0 = scmp.ne.s32.totalorder %s3495_s19, 0 }
 0x434   : > { %p3498_p11 = scmp.ge.s32.totalorder %s3496_s26, 2  ;;  %s1607_s13 = scalar_lea.sflag [#allocation4], %s1606_s25 }
 0x436   : > { %p2200_p3 = pnand %p3498_p11, %p3497_p0 }
 0x438   : > { %2700 = dma.done.wait (!%p2200_p3), %s1607_s13, 128  }
 0x439   : > { %2702 = vsyncadd (!%p2200_p3), %s1607_s13, 4294967168  ;;  %s37_s18 = sadd.s32 1, %s3496_s26   ;;  %s3499_s13 = sld [smem:[#allocation29_spill]] }
 0x43a   : > { %p34_p6 = scmp.ge.s32.totalorder %s37_s18, 4   ;;  %s3500_s14 = sld [smem:[#allocation30_spill]] }
 0x43b   : > { %s3501_s15 = sld [smem:[#allocation40_spill]]  ;;  %s3502_s16 = sld [smem:[#allocation32_spill]] }
 0x43c   : > { %s3503_s17 = sld [smem:[#allocation38_spill]]  ;;  %36 = sbr.rel (!%p34_p6) target bundleno = 20 (0x14), region = 186 }
 0x443   :  { %1612 = vsyncpa [#allocation3], 1 }
 0x444   :  { %1614 = vsyncpa [#allocation3 + $0x1], 1 }
 0x445   :  { %1615 = vsyncpa [#allocation6], 1 }
 0x446   :  { %1617 = vsyncpa [#allocation6 + $0x1], 1 }
 0x447   :  { %1618 = vsyncpa [#allocation9], 1 }
 0x448   :  { %1620 = vsyncpa [#allocation9 + $0x1], 1 }
 0x449   :  { %1621 = vsyncpa [#allocation12], 1 }
 0x44a   :  { %1623 = vsyncpa [#allocation12 + $0x1], 1 }
 0x44b   :  { %1624 = vsyncpa [#allocation15], 1 }
 0x44c   :  { %1625 = vsyncpa [#allocation18], 1 }
 0x44d   :  { %1626 = vsyncpa [#allocation4], 1 }
 0x44e   :  { %1628 = vsyncpa [#allocation4 + $0x1], 1 }

</bundles_post_ra>
